<compile_context>
chip_gen: v6e
topology: v6e:2x2x1
jax: 0.10.0
libtpu: 0.0.40
codegen_flags: <defaults>
</compile_context>

<pallas_src>
import math

import jax
import jax.numpy as jnp
from jax.experimental import pallas as pl
from jax.experimental.pallas import tpu as pltpu


def _round_up(x, m):
    return ((x + m - 1) // m) * m


def _gathered_linear_kernel(nodes_ref, x_ref, w_ref, o_ref):
    """One row-tile per grid step.

    nodes_ref: (TM, 1)   int32  per-row weight indices for this tile (VMEM)
    x_ref:     (TM, IN)  input rows for this tile
    w_ref:     (B, IN, OUT)     FULL weight table, VMEM-resident
    o_ref:     (TM, OUT)        output rows for this tile
    """
    x = x_ref[...]
    node_ids = nodes_ref[...]                                # (TM, 1) int32
    acc = jnp.zeros(o_ref.shape, jnp.float32)
    # batch_size is a compile-time constant -> static unrolled loop, static slices.
    for b in range(w_ref.shape[0]):
        row_mask = (node_ids == b).astype(x.dtype)           # (TM, 1)
        acc = acc + jnp.dot(x * row_mask, w_ref[b],
                            preferred_element_type=jnp.float32)
    o_ref[...] = acc.astype(o_ref.dtype)


def gathered_linear(x, weight, nodes, *, tm=128,
                    vmem_budget_bytes=48 * 1024 * 1024):
    """output[i] = x[i] @ weight[nodes[i]]  (bias unused, matching forward())."""
    n, in_features = x.shape
    batch_size, in_w, out_features = weight.shape
    assert in_w == in_features

    # Row tile: fill the MXU M dimension (up to 128), multiple of 8 (f32 sublanes).
    tm = max(8, min(tm, _round_up(max(n, 1), 8)))
    n_pad = _round_up(n, tm)
    if n_pad != n:
        x = jnp.pad(x, ((0, n_pad - n), (0, 0)))
        nodes = jnp.pad(nodes, (0, n_pad - n))   # padded rows use weight 0, sliced off below
    nodes2d = nodes.astype(jnp.int32).reshape(n_pad, 1)

    # Whole weight table stays VMEM-resident (constant index_map -> single DMA).
    itemsize = jnp.dtype(weight.dtype).itemsize
    weight_bytes = batch_size * in_features * out_features * itemsize
    tile_bytes = 2 * tm * (in_features + out_features + 1) * 4  # double-buffered x/out/nodes
    if weight_bytes + tile_bytes > vmem_budget_bytes:
        # TODO(synk): add an MoE-style grouped path (sort rows by node + scalar-prefetched
        # group offsets) for weight tables too large to keep resident in VMEM.
        raise ValueError("weight table does not fit the VMEM budget")

    grid = (n_pad // tm,)
    flops = 2 * n_pad * in_features * out_features * batch_size
    bytes_accessed = (weight_bytes
                      + n_pad * (in_features + out_features) * 4   # x + out
                      + n_pad * 4)                                 # nodes

    out = pl.pallas_call(
        _gathered_linear_kernel,
        out_shape=jax.ShapeDtypeStruct((n_pad, out_features), x.dtype),
        grid=grid,
        in_specs=[
            pl.BlockSpec((tm, 1), lambda i: (i, 0)),                       # nodes (per tile)
            pl.BlockSpec((tm, in_features), lambda i: (i, 0)),             # x rows (per tile)
            pl.BlockSpec((batch_size, in_features, out_features),
                         lambda i: (0, 0, 0)),                             # full weight table
        ],
        out_specs=pl.BlockSpec((tm, out_features), lambda i: (i, 0)),
        compiler_params=pltpu.CompilerParams(
            dimension_semantics=("parallel",),      # disjoint output tiles -> megacore shardable
            vmem_limit_bytes=vmem_budget_bytes),
        cost_estimate=pl.CostEstimate(
            flops=flops, transcendentals=0, bytes_accessed=bytes_accessed),
    )(nodes2d, x, weight)
    return out[:n]


def reference(x, weight, nodes):
    # hidden = x[:, None, :]; out = bmm(hidden, weight[nodes]); squeeze
    sub_w = weight[nodes]                       # [N, in, out]
    return jnp.einsum("ni,nio->no", x, sub_w)


if __name__ == "__main__":
    # Module hyperparameters (small, synthetic)
    batch_size = 6        # leading dim of weight (per-node weight matrices)
    in_features = 32
    out_features = 128

    key = jax.random.PRNGKey(0)
    k_w, k_b, k_x, k_n = jax.random.split(key, 4)

    # Deterministic init matching reset_parameters(): U(-stdv, stdv), stdv = 1/sqrt(weight.size(1))
    stdv = 1.0 / math.sqrt(in_features)
    weight = jax.random.uniform(
        k_w, (batch_size, in_features, out_features),
        minval=-stdv, maxval=stdv, dtype=jnp.float32)
    bias = jax.random.uniform(
        k_b, (batch_size, out_features),
        minval=-stdv, maxval=stdv, dtype=jnp.float32)  # unused in forward()

    # Two cases: multi-tile grid with padding (n=200) and tiny n (n=4).
    for n_rows in (200, 4):
        kx, kn = jax.random.split(jax.random.fold_in(k_x, n_rows))
        x = jax.random.normal(kx, (n_rows, in_features), dtype=jnp.float32)
        nodes = jax.random.randint(kn, (n_rows,), 0, batch_size, dtype=jnp.int32)

        out = gathered_linear(x, weight, nodes)
        jax.block_until_ready(out)

        ref = reference(x, weight, nodes)
        assert out.shape == (n_rows, out_features)
        assert jnp.allclose(out, ref, atol=1e-5, rtol=1e-5), "mismatch vs reference"

    print("KERNEL_OK")
</pallas_src>

<mosaic_0001>
module attributes {stable_mosaic.version = 11 : i64} {
  func.func @_gathered_linear_kernel(%arg0: i32, %arg1: memref<128x1xi32, #tpu.memory_space<vmem>>, %arg2: memref<128x32xf32, #tpu.memory_space<vmem>>, %arg3: memref<6x32x128xf32, #tpu.memory_space<vmem>>, %arg4: memref<128x128xf32, #tpu.memory_space<vmem>>) attributes {dimension_semantics = [#tpu.dimension_semantics<parallel>], iteration_bounds = array<i64: 2>, scalar_prefetch = 0 : i64, scratch_operands = 0 : i64, tpu.core_type = #tpu.core_type<tc>, window_params = [{transform_indices = @transform_0, window_bounds = array<i64: 128, 1>}, {transform_indices = @transform_1, window_bounds = array<i64: 128, 32>}, {pipeline_mode = #tpu.pipeline_mode<synchronous>, transform_indices = @transform_2, window_bounds = array<i64: 6, 32, 128>}, {transform_indices = @transform_3, window_bounds = array<i64: 128, 128>}]} {
    %c0 = arith.constant 0 : index
    %c0_0 = arith.constant 0 : index
    %0 = vector.load %arg2[%c0, %c0_0] : memref<128x32xf32, #tpu.memory_space<vmem>>, vector<128x32xf32>
    %c0_1 = arith.constant 0 : index
    %c0_2 = arith.constant 0 : index
    %1 = vector.load %arg1[%c0_1, %c0_2] : memref<128x1xi32, #tpu.memory_space<vmem>>, vector<128x1xi32>
    %cst = arith.constant 0.000000e+00 : f32
    %2 = vector.broadcast %cst : f32 to vector<128x128xf32>
    %c0_i32 = arith.constant 0 : i32
    %3 = vector.broadcast %c0_i32 : i32 to vector<128x1xi32>
    %4 = arith.cmpi eq, %1, %3 : vector<128x1xi32>
    %5 = arith.extui %4 : vector<128x1xi1> to vector<128x1xi32>
    %6 = arith.sitofp %5 : vector<128x1xi32> to vector<128x1xf32>
    %7 = vector.broadcast %6 : vector<128x1xf32> to vector<128x32xf32>
    %8 = arith.mulf %0, %7 : vector<128x32xf32>
    %c0_3 = arith.constant 0 : index
    %c0_4 = arith.constant 0 : index
    %c0_5 = arith.constant 0 : index
    %9 = vector.load %arg3[%c0_3, %c0_4, %c0_5] : memref<6x32x128xf32, #tpu.memory_space<vmem>>, vector<1x32x128xf32>
    %10 = vector.shape_cast %9 : vector<1x32x128xf32> to vector<32x128xf32>
    %cst_6 = arith.constant dense<0.000000e+00> : vector<128x128xf32>
    %11 = tpu.matmul %8, %10, %cst_6 {dimension_numbers = #tpu.dot_dimension_numbers<[1], [0], [0], [1], [0, 0, 1, 1], [], []>} : vector<128x32xf32>, vector<32x128xf32>, vector<128x128xf32> -> vector<128x128xf32>
    %12 = arith.addf %2, %11 : vector<128x128xf32>
    %c1_i32 = arith.constant 1 : i32
    %13 = vector.broadcast %c1_i32 : i32 to vector<128x1xi32>
    %14 = arith.cmpi eq, %1, %13 : vector<128x1xi32>
    %15 = arith.extui %14 : vector<128x1xi1> to vector<128x1xi32>
    %16 = arith.sitofp %15 : vector<128x1xi32> to vector<128x1xf32>
    %17 = vector.broadcast %16 : vector<128x1xf32> to vector<128x32xf32>
    %18 = arith.mulf %0, %17 : vector<128x32xf32>
    %c1 = arith.constant 1 : index
    %c0_7 = arith.constant 0 : index
    %c0_8 = arith.constant 0 : index
    %19 = vector.load %arg3[%c1, %c0_7, %c0_8] : memref<6x32x128xf32, #tpu.memory_space<vmem>>, vector<1x32x128xf32>
    %20 = vector.shape_cast %19 : vector<1x32x128xf32> to vector<32x128xf32>
    %cst_9 = arith.constant dense<0.000000e+00> : vector<128x128xf32>
    %21 = tpu.matmul %18, %20, %cst_9 {dimension_numbers = #tpu.dot_dimension_numbers<[1], [0], [0], [1], [0, 0, 1, 1], [], []>} : vector<128x32xf32>, vector<32x128xf32>, vector<128x128xf32> -> vector<128x128xf32>
    %22 = arith.addf %12, %21 : vector<128x128xf32>
    %c2_i32 = arith.constant 2 : i32
    %23 = vector.broadcast %c2_i32 : i32 to vector<128x1xi32>
    %24 = arith.cmpi eq, %1, %23 : vector<128x1xi32>
    %25 = arith.extui %24 : vector<128x1xi1> to vector<128x1xi32>
    %26 = arith.sitofp %25 : vector<128x1xi32> to vector<128x1xf32>
    %27 = vector.broadcast %26 : vector<128x1xf32> to vector<128x32xf32>
    %28 = arith.mulf %0, %27 : vector<128x32xf32>
    %c2 = arith.constant 2 : index
    %c0_10 = arith.constant 0 : index
    %c0_11 = arith.constant 0 : index
    %29 = vector.load %arg3[%c2, %c0_10, %c0_11] : memref<6x32x128xf32, #tpu.memory_space<vmem>>, vector<1x32x128xf32>
    %30 = vector.shape_cast %29 : vector<1x32x128xf32> to vector<32x128xf32>
    %cst_12 = arith.constant dense<0.000000e+00> : vector<128x128xf32>
    %31 = tpu.matmul %28, %30, %cst_12 {dimension_numbers = #tpu.dot_dimension_numbers<[1], [0], [0], [1], [0, 0, 1, 1], [], []>} : vector<128x32xf32>, vector<32x128xf32>, vector<128x128xf32> -> vector<128x128xf32>
    %32 = arith.addf %22, %31 : vector<128x128xf32>
    %c3_i32 = arith.constant 3 : i32
    %33 = vector.broadcast %c3_i32 : i32 to vector<128x1xi32>
    %34 = arith.cmpi eq, %1, %33 : vector<128x1xi32>
    %35 = arith.extui %34 : vector<128x1xi1> to vector<128x1xi32>
    %36 = arith.sitofp %35 : vector<128x1xi32> to vector<128x1xf32>
    %37 = vector.broadcast %36 : vector<128x1xf32> to vector<128x32xf32>
    %38 = arith.mulf %0, %37 : vector<128x32xf32>
    %c3 = arith.constant 3 : index
    %c0_13 = arith.constant 0 : index
    %c0_14 = arith.constant 0 : index
    %39 = vector.load %arg3[%c3, %c0_13, %c0_14] : memref<6x32x128xf32, #tpu.memory_space<vmem>>, vector<1x32x128xf32>
    %40 = vector.shape_cast %39 : vector<1x32x128xf32> to vector<32x128xf32>
    %cst_15 = arith.constant dense<0.000000e+00> : vector<128x128xf32>
    %41 = tpu.matmul %38, %40, %cst_15 {dimension_numbers = #tpu.dot_dimension_numbers<[1], [0], [0], [1], [0, 0, 1, 1], [], []>} : vector<128x32xf32>, vector<32x128xf32>, vector<128x128xf32> -> vector<128x128xf32>
    %42 = arith.addf %32, %41 : vector<128x128xf32>
    %c4_i32 = arith.constant 4 : i32
    %43 = vector.broadcast %c4_i32 : i32 to vector<128x1xi32>
    %44 = arith.cmpi eq, %1, %43 : vector<128x1xi32>
    %45 = arith.extui %44 : vector<128x1xi1> to vector<128x1xi32>
    %46 = arith.sitofp %45 : vector<128x1xi32> to vector<128x1xf32>
    %47 = vector.broadcast %46 : vector<128x1xf32> to vector<128x32xf32>
    %48 = arith.mulf %0, %47 : vector<128x32xf32>
    %c4 = arith.constant 4 : index
    %c0_16 = arith.constant 0 : index
    %c0_17 = arith.constant 0 : index
    %49 = vector.load %arg3[%c4, %c0_16, %c0_17] : memref<6x32x128xf32, #tpu.memory_space<vmem>>, vector<1x32x128xf32>
    %50 = vector.shape_cast %49 : vector<1x32x128xf32> to vector<32x128xf32>
    %cst_18 = arith.constant dense<0.000000e+00> : vector<128x128xf32>
    %51 = tpu.matmul %48, %50, %cst_18 {dimension_numbers = #tpu.dot_dimension_numbers<[1], [0], [0], [1], [0, 0, 1, 1], [], []>} : vector<128x32xf32>, vector<32x128xf32>, vector<128x128xf32> -> vector<128x128xf32>
    %52 = arith.addf %42, %51 : vector<128x128xf32>
    %c5_i32 = arith.constant 5 : i32
    %53 = vector.broadcast %c5_i32 : i32 to vector<128x1xi32>
    %54 = arith.cmpi eq, %1, %53 : vector<128x1xi32>
    %55 = arith.extui %54 : vector<128x1xi1> to vector<128x1xi32>
    %56 = arith.sitofp %55 : vector<128x1xi32> to vector<128x1xf32>
    %57 = vector.broadcast %56 : vector<128x1xf32> to vector<128x32xf32>
    %58 = arith.mulf %0, %57 : vector<128x32xf32>
    %c5 = arith.constant 5 : index
    %c0_19 = arith.constant 0 : index
    %c0_20 = arith.constant 0 : index
    %59 = vector.load %arg3[%c5, %c0_19, %c0_20] : memref<6x32x128xf32, #tpu.memory_space<vmem>>, vector<1x32x128xf32>
    %60 = vector.shape_cast %59 : vector<1x32x128xf32> to vector<32x128xf32>
    %cst_21 = arith.constant dense<0.000000e+00> : vector<128x128xf32>
    %61 = tpu.matmul %58, %60, %cst_21 {dimension_numbers = #tpu.dot_dimension_numbers<[1], [0], [0], [1], [0, 0, 1, 1], [], []>} : vector<128x32xf32>, vector<32x128xf32>, vector<128x128xf32> -> vector<128x128xf32>
    %62 = arith.addf %52, %61 : vector<128x128xf32>
    %c0_22 = arith.constant 0 : index
    %c0_23 = arith.constant 0 : index
    %63 = vector.load %arg4[%c0_22, %c0_23] : memref<128x128xf32, #tpu.memory_space<vmem>>, vector<128x128xf32>
    tpu.vector_store %arg4[%c0_22, %c0_23], %62 {strides = array<i32>} : memref<128x128xf32, #tpu.memory_space<vmem>>, vector<128x128xf32>,
    return
  }
  func.func @transform_0(%arg0: i32) -> (i32, i32) {
    %c0_i32 = arith.constant 0 : i32
    %c0_i32_0 = arith.constant 0 : i32
    return %arg0, %c0_i32 : i32, i32
  }
  func.func @transform_1(%arg0: i32) -> (i32, i32) {
    %c0_i32 = arith.constant 0 : i32
    %c0_i32_0 = arith.constant 0 : i32
    return %arg0, %c0_i32 : i32, i32
  }
  func.func @transform_2(%arg0: i32) -> (i32, i32, i32) {
    %c0_i32 = arith.constant 0 : i32
    %c0_i32_0 = arith.constant 0 : i32
    %c0_i32_1 = arith.constant 0 : i32
    %c0_i32_2 = arith.constant 0 : i32
    return %c0_i32, %c0_i32_0, %c0_i32_1 : i32, i32, i32
  }
  func.func @transform_3(%arg0: i32) -> (i32, i32) {
    %c0_i32 = arith.constant 0 : i32
    %c0_i32_0 = arith.constant 0 : i32
    return %arg0, %c0_i32 : i32, i32
  }
}

</mosaic_0001>

<bundles_post_ra>
// kernel: tpu_custom_call.1
= control target key start
LH: loop header
LB: loop body
LE: loop exit
PB: predicated region body
PF: predicated region fallthrough
CT: control target
= control target key end

     0   :  { %8 = vsyncpa [#allocation3], 0  ;;  %s4383_s0 = inlined_call_operand.vmem [shape: s32[256,1], index: 0, kind: input, shape index: {}]   ;;  %s4384_s1 = inlined_call_operand.vmem [shape: f32[256,32], index: 1, kind: input, shape index: {}]   ;;  %s4385_s2 = inlined_call_operand.vmem [shape: f32[6,32,128], index: 2, kind: input, shape index: {}]   ;;  %s4386_s3 = inlined_call_operand.hbm [shape: f32[256,128], index: 3, kind: output, shape index: {}]  }
   0x1   :  { %10 = vsyncpa [#allocation3 + $0x1], 0  ;;  %s3357_s12 = smov 0   ;;  %s3359_s13 = smov 0  }
   0x2   :  { %s3361_s14 = smov 0   ;;  %s3363_s15 = smov 0  }
   0x3 LB: > { %s3378_s16 = sadd.s32 4294967295, %s3330_s15   ;;  %s2446_s17 = sadd.s32 4294967294, %s3330_s15   ;;  %s3330_s15 = sphi %s3363_s15, %s4416_s15   ;;  %s3326_s14 = sphi %s3361_s14, %s4415_s14   ;;  %s3322_s13 = sphi %s3359_s13, %s4414_s13   ;;  %s3318_s12 = sphi %s3357_s12, %s4413_s12  }
   0x4   : > { %s3382_s18 = sadd.s32 1, %s3330_s15   ;;  %s96_s19 = sadd.s32 1, %s3326_s14 }
   0x5   : > { %s93_s20 = ssub.s32 %s3330_s15, %s3382_s18  ;;  %p106_p0 = scmp.ne.s32.totalorder %s3326_s14, %s3322_s13 }
   0x6   : > { %p94_p1 = scmp.eq.s32.totalorder %s93_s20, 0  ;;  %p107_p2 = scmp.eq.s32.totalorder %s3378_s16, 1 }
   0x7   : > { %p112_p3 = scmp.ne.s32.totalorder %s3322_s13, %s3318_s12  ;;  %p113_p4 = scmp.eq.s32.totalorder %s2446_s17, 1 }
   0x8   : > { %s3393_s21 = scalar_select %p94_p1, %s3326_s14, %s96_s19  }
   0x9   : > { %p3395_p5 = por %p107_p2, %p106_p0  ;;  %p3399_p6 = por %p113_p4, %p112_p3 }
   0xa   : > { %p2449_p7 = scmp.ge.s32.totalorder %s3330_s15, 1  ;;  %p152_p8 = scmp.lt.s32.totalorder %s3330_s15, 3 }
   0xc   : > { %p153_p9 = pnand %p2449_p7, %p152_p8 }
   0xe   : > { %156 = sbr.rel (%p153_p9) target bundleno = 473 (0x1d9), region = 32 }
  0x13   : > { %s2451_s24 = sshll.u32 %s3378_s16, 4  ;;  %v373_v0 = vld [vmem:[%s4385_s2 + $0x18] sm:$0xff]  ;;  %v3332_v1 = vmov 0   ;;  %v372_v2 = vld [vmem:[%s4385_s2 + $0x10] sm:$0xff]  ;;  %v3333_v8 = vmov 0.0   ;;  %v371_v27 = vld [vmem:[%s4385_s2 + $0x8] sm:$0xff] }
  0x14   : > { %3039 = vset.pattern.permute.xlu1 %v3332_v1  ;;  %3028 = vset.pattern.permute.xlu0 %v3332_v1  ;;  %p182_p10 = scmp.lt.s32.totalorder %s2451_s24, 31  ;;  %v2490_v28 = vld [vmem:[%s4385_s2 + $0x38] sm:$0xff]  ;;  %v370_v32 = vld [vmem:[%s4385_s2] sm:$0xff]  ;;  %v2489_v34 = vld [vmem:[%s4385_s2 + $0x30] sm:$0xff]  ;;  %s178_s27 = sand.u32 1, %s3322_s13  }
  0x15   : > { %2825 = vmatprep.subr.mxu1 %v373_v0  ;;  %2793 = vmatprep.subr.mxu0 %v2490_v28  ;;  %v2488_v41 = vld [vmem:[%s4385_s2 + $0x28] sm:$0xff]  ;;  %v2487_v46 = vld [vmem:[%s4385_s2 + $0x20] sm:$0xff]  ;;  %v3543_v54 = vld [vmem:[%s4385_s2 + $0x58] sm:$0xff]  ;;  %s2450_s28 = sshll.u32 %s178_s27, 7  ;;  %s2672_s4 = sshll.u32 %s3378_s16, 11 }
  0x16   : > { %s4418_s24 = smov (!%p182_p10, %s2451_s24), 31  ;;  %2826 = vmatpush3.msra.mxu1 %v373_v0  ;;  %2794 = vmatpush3.msra.mxu0 %v2490_v28  ;;  %v3552_v55 = vld [vmem:[%s4385_s2 + $0x78] sm:$0xff]  ;;  %s4275_s30 = scalar_lea.vmem [#allocation2], %s2450_s28 }
  0x17   : > { %2827 = vmatprep.subr.mxu1 %v372_v2  ;;  %s2452_s29 = sshll.u32 %s4418_s24, 3  ;;  %2795 = vmatprep.subr.mxu0 %v2489_v34  ;;  %s2372_s6 = sshll.u32 %s4275_s30, 4  ;;  %s4337_s6 = int_to_ptr.vmem [resolvable:$true] %s2372_s6 }
  0x18   : > { %2828 = vmatpush3.msra.mxu1 %v372_v2  ;;  %s3420_s5 = scalar_lea.vmem %s4383_s0, %s2452_s29  ;;  %2796 = vmatpush3.msra.mxu0 %v2489_v34  ;;  %s3870_s8 = scalar_lea.vmem %s4384_s1, %s2452_s29 }
  0x19   : > { %v3423_v3 = vld [vmem:[%s3420_s5 + $0x20] sm:$0xff]  ;;  %v3426_v4 = vld [vmem:[%s3420_s5 + $0x28] sm:$0xff]  ;;  %v3438_v7 = vld [vmem:[%s3420_s5 + $0x30] sm:$0xff]  ;;  %2829 = vmatprep.subr.mxu1 %v371_v27  ;;  %2797 = vmatprep.subr.mxu0 %v2488_v41  ;;  %s4343_s16 = scalar_lea.sflag [#allocation3], %s178_s27  ;;  %s3270_s24 = scalar_lea.vmem %s4337_s6, 2048 }
  0x1a   : > { %v3429_v5 = vld [vmem:[%s3420_s5] sm:$0xff]  ;;  %vm230_vm0 = vcmp.eq.s32.totalorder %v3423_v3, 0  ;;  %vm231_vm1 = vcmp.eq.s32.totalorder %v3426_v4, 0  ;;  %v3434_v6 = vld [vmem:[%s3420_s5 + $0x8] sm:$0xff]  ;;  %v3446_v12 = vld [vmem:[%s3420_s5 + $0x10] sm:$0xff]  ;;  %vm232_vm5 = vcmp.eq.s32.totalorder %v3438_v7, 0  ;;  %2830 = vmatpush3.msra.mxu1 %v371_v27  ;;  %2798 = vmatpush3.msra.mxu0 %v2488_v41  ;;  %p3271_p11 = scmp.ne.s32.totalorder %s4337_s6, %s3270_s24 }
  0x1b   : > { %vm226_vm2 = vcmp.eq.s32.totalorder %v3429_v5, 0  ;;  %vm374_vm3 = vcmp.eq.s32.totalorder %v3429_v5, 1  ;;  %v2459_v9 = vsel %vm230_vm0, 1.0, %v3333_v8  ;;  %v2460_v10 = vsel %vm231_vm1, 1.0, %v3333_v8  ;;  %v3449_v13 = vld [vmem:[%s3420_s5 + $0x18] sm:$0xff]  ;;  %v3479_v30 = vld [vmem:[%s3420_s5 + $0x40] sm:$0xff]  ;;  %2831 = vmatprep.subr.mxu1 %v370_v32  ;;  %2799 = vmatprep.subr.mxu0 %v2487_v46 }
  0x1c   : > { %vm227_vm4 = vcmp.eq.s32.totalorder %v3434_v6, 0  ;;  %v2455_v11 = vsel %vm226_vm2, 1.0, %v3333_v8  ;;  %v3040_v14 = vpack.i.bf16 %v2460_v10, %v2459_v9  ;;  %v2471_v16 = vsel %vm374_vm3, 1.0, %v3333_v8  ;;  %v3458_v19 = vld [vmem:[%s3420_s5 + $0x38] sm:$0xff]  ;;  %v3482_v31 = vld [vmem:[%s3420_s5 + $0x48] sm:$0xff]  ;;  %v3501_v40 = vld [vmem:[%s3420_s5 + $0x50] sm:$0xff]  ;;  %2832 = vmatpush3.msra.mxu1 %v370_v32  ;;  %2800 = vmatpush3.msra.mxu0 %v2487_v46  ;;  %p3272_p12 = pnand %p3271_p11, %p3395_p5 }
  0x1d   : > { %v2456_v15 = vsel %vm227_vm4, 1.0, %v3333_v8  ;;  %v2461_v18 = vsel %vm232_vm5, 1.0, %v3333_v8  ;;  %vm228_vm6 = vcmp.eq.s32.totalorder %v3446_v12, 0  ;;  %vm229_vm7 = vcmp.eq.s32.totalorder %v3449_v13, 0  ;;  %v3509_v42 = vld [vmem:[%s3420_s5 + $0x58] sm:$0xff]  ;;  %v3512_v44 = vld [vmem:[%s3420_s5 + $0x60] sm:$0xff]  ;;  %2857 = vmatprep.subr.mxu0 %v3543_v54  ;;  %2889 = vmatprep.subr.mxu1 %v3552_v55 }
  0x1e   : > { %v3029_v17 = vpack.i.bf16 %v2456_v15, %v2455_v11  ;;  %3041 = vperm.xlu1 %3039, %v3040_v14   ;;  %v3045_v20 = vpack.i.bf16 %v2471_v16, %v2461_v18  ;;  %v2457_v21 = vsel %vm228_vm6, 1.0, %v3333_v8  ;;  %v2458_v22 = vsel %vm229_vm7, 1.0, %v3333_v8  ;;  %v3515_v45 = vld [vmem:[%s3420_s5 + $0x68] sm:$0xff]  ;;  %v3535_v52 = vld [vmem:[%s3420_s5 + $0x70] sm:$0xff]  ;;  %v3538_v53 = vld [vmem:[%s3420_s5 + $0x78] sm:$0xff]  ;;  %p3273_p13 = pneg %p3272_p12  ;;  %s3334_s29 = smov [#allocation2]  }
  0x1f   : > { %vm377_vm8 = vcmp.eq.s32.totalorder %v3449_v13, 1  ;;  %v3034_v23 = vpack.i.bf16 %v2458_v22, %v2457_v21  ;;  %vm378_vm9 = vcmp.eq.s32.totalorder %v3423_v3, 1  ;;  %vm375_vm10 = vcmp.eq.s32.totalorder %v3434_v6, 1  ;;  %s3274_s9 = sshll.u32 %s3334_s29, 4  ;;  %s3275_s9 = int_to_ptr.vmem [resolvable:$false] %s3274_s9 }
  0x20   : > { %3030 = vperm.xlu0 %3028, %v3029_v17   ;;  %v2474_v24 = vsel %vm377_vm8, 1.0, %v3333_v8  ;;  %v2475_v25 = vsel %vm378_vm9, 1.0, %v3333_v8  ;;  %vm376_vm11 = vcmp.eq.s32.totalorder %v3446_v12, 1  ;;  %v2472_v26 = vsel %vm375_vm10, 1.0, %v3333_v8  ;;  %s3276_s10 = scalar_lea.vmem %s3275_s9, 4096  ;;  %p3277_p0 = scmp.lt.s32.totalorder %s4337_s6, %s3275_s9 }
  0x21   : > { %vm233_vm12 = vcmp.eq.s32.totalorder %v3458_v19, 0  ;;  %v2473_v29 = vsel %vm376_vm11, 1.0, %v3333_v8  ;;  %vm381_vm13 = vcmp.eq.s32.totalorder %v3458_v19, 1  ;;  %v3055_v33 = vpack.i.bf16 %v2475_v25, %v2474_v24  ;;  %p3278_p1 = scmp.lt.s32.totalorder %s3276_s10, %s3270_s24 }
  0x22   : > { %3046 = vperm.xlu1 %3039, %v3045_v20   ;;  %vm379_vm14 = vcmp.eq.s32.totalorder %v3426_v4, 1  ;;  %vm380_vm15 = vcmp.eq.s32.totalorder %v3438_v7, 1  ;;  %v3050_v35 = vpack.i.bf16 %v2473_v29, %v2472_v26  ;;  %v2462_v36 = vsel %vm233_vm12, 1.0, %v3333_v8 }
  0x23   : > { %v2478_v37 = vsel %vm381_vm13, 1.0, %v3333_v8  ;;  %v2476_v38 = vsel %vm379_vm14, 1.0, %v3333_v8  ;;  %v2477_v39 = vsel %vm380_vm15, 1.0, %v3333_v8  ;;  %vm234_vm0 = vcmp.eq.s32.totalorder %v3479_v30, 0  ;;  %p3279_p2 = por %p3278_p1, %p3277_p0 }
  0x24   : > { %3035 = vperm.xlu0 %3028, %v3034_v23   ;;  %vm235_vm1 = vcmp.eq.s32.totalorder %v3482_v31, 0  ;;  %vm382_vm2 = vcmp.eq.s32.totalorder %v3479_v30, 1  ;;  %vm383_vm3 = vcmp.eq.s32.totalorder %v3482_v31, 1  ;;  %v3065_v43 = vpack.i.bf16 %v2462_v36, %v2478_v37 }
  0x25   : > { %v3060_v47 = vpack.i.bf16 %v2477_v39, %v2476_v38  ;;  %v2463_v48 = vsel %vm234_vm0, 1.0, %v3333_v8  ;;  %v2464_v49 = vsel %vm235_vm1, 1.0, %v3333_v8  ;;  %vm236_vm4 = vcmp.eq.s32.totalorder %v3501_v40, 0  ;;  %p3280_p3 = pnand %p3279_p2, %p3273_p13 }
  0x26   : > { %3056 = vperm.xlu1 %3039, %v3055_v33   ;;  %v2479_v50 = vsel %vm382_vm2, 1.0, %v3333_v8  ;;  %v2480_v51 = vsel %vm383_vm3, 1.0, %v3333_v8  ;;  %vm237_vm5 = vcmp.eq.s32.totalorder %v3509_v42, 0  ;;  %vm384_vm6 = vcmp.eq.s32.totalorder %v3501_v40, 1 }
  0x27   : > { %vm385_vm7 = vcmp.eq.s32.totalorder %v3509_v42, 1  ;;  %vm238_vm8 = vcmp.eq.s32.totalorder %v3512_v44, 0  ;;  %vm239_vm9 = vcmp.eq.s32.totalorder %v3515_v45, 0  ;;  %v3075_v56 = vpack.i.bf16 %v2464_v49, %v2463_v48 }
  0x28   : > { %3051 = vperm.xlu0 %3028, %v3050_v35   ;;  %v2465_v57 = vsel %vm236_vm4, 1.0, %v3333_v8  ;;  %vm386_vm10 = vcmp.eq.s32.totalorder %v3512_v44, 1  ;;  %vm387_vm11 = vcmp.eq.s32.totalorder %v3515_v45, 1  ;;  %v3070_v58 = vpack.i.bf16 %v2480_v51, %v2479_v50 }
  0x29   : > { %v2466_v59 = vsel %vm237_vm5, 1.0, %v3333_v8  ;;  %vm240_vm12 = vcmp.eq.s32.totalorder %v3535_v52, 0  ;;  %vm241_vm13 = vcmp.eq.s32.totalorder %v3538_v53, 0  ;;  %v2481_v60 = vsel %vm384_vm6, 1.0, %v3333_v8 }
  0x2a   : > { %3066 = vperm.xlu1 %3039, %v3065_v43   ;;  %v2482_v61 = vsel %vm385_vm7, 1.0, %v3333_v8  ;;  %v2467_v62 = vsel %vm238_vm8, 1.0, %v3333_v8  ;;  %v2468_v63 = vsel %vm239_vm9, 1.0, %v3333_v8  ;;  %v2483_v0 = vsel %vm386_vm10, 1.0, %v3333_v8 }
  0x2b   : > { %v2484_v1 = vsel %vm387_vm11, 1.0, %v3333_v8  ;;  %vm388_vm14 = vcmp.eq.s32.totalorder %v3535_v52, 1  ;;  %vm389_vm15 = vcmp.eq.s32.totalorder %v3538_v53, 1  ;;  %v3085_v2 = vpack.i.bf16 %v2466_v59, %v2465_v57 }
  0x2c   : > { %3061 = vperm.xlu0 %3028, %v3060_v47   ;;  %v2469_v9 = vsel %vm240_vm12, 1.0, %v3333_v8  ;;  %v2470_v10 = vsel %vm241_vm13, 1.0, %v3333_v8  ;;  %vm1268_vm0 = vcmp.eq.s32.totalorder %v3429_v5, 3  ;;  %v3080_v11 = vpack.i.bf16 %v2482_v61, %v2481_v60 }
  0x2d   : > { %vm1269_vm1 = vcmp.eq.s32.totalorder %v3434_v6, 3  ;;  %v3095_v14 = vpack.i.bf16 %v2468_v63, %v2467_v62  ;;  %v3090_v15 = vpack.i.bf16 %v2484_v1, %v2483_v0  ;;  %v2485_v16 = vsel %vm388_vm14, 1.0, %v3333_v8 }
  0x2e   : > { %3076 = vperm.xlu1 %3039, %v3075_v56   ;;  %v2486_v17 = vsel %vm389_vm15, 1.0, %v3333_v8  ;;  %v3105_v18 = vpack.i.bf16 %v2470_v10, %v2469_v9  ;;  %v2559_v20 = vsel %vm1268_vm0, 1.0, %v3333_v8  ;;  %vm910_vm2 = vcmp.eq.s32.totalorder %v3429_v5, 2 }
  0x2f   : > { %vm911_vm3 = vcmp.eq.s32.totalorder %v3434_v6, 2  ;;  %v2560_v21 = vsel %vm1269_vm1, 1.0, %v3333_v8  ;;  %vm1270_vm4 = vcmp.eq.s32.totalorder %v3446_v12, 3  ;;  %vm1271_vm5 = vcmp.eq.s32.totalorder %v3449_v13, 3 }
  0x30   : > { %3071 = vperm.xlu0 %3028, %v3070_v58   ;;  %vm912_vm6 = vcmp.eq.s32.totalorder %v3446_v12, 2  ;;  %v3100_v22 = vpack.i.bf16 %v2486_v17, %v2485_v16  ;;  %vm913_vm7 = vcmp.eq.s32.totalorder %v3449_v13, 2  ;;  %vm1272_vm8 = vcmp.eq.s32.totalorder %v3423_v3, 3 }
  0x31   : > { %vm1273_vm9 = vcmp.eq.s32.totalorder %v3426_v4, 3  ;;  %v2523_v23 = vsel %vm910_vm2, 1.0, %v3333_v8  ;;  %v2524_v24 = vsel %vm911_vm3, 1.0, %v3333_v8  ;;  %vm914_vm10 = vcmp.eq.s32.totalorder %v3423_v3, 2 }
  0x32   : > { %3086 = vperm.xlu1 %3039, %v3085_v2   ;;  %vm915_vm11 = vcmp.eq.s32.totalorder %v3426_v4, 2  ;;  %v3115_v25 = vpack.i.bf16 %v2560_v21, %v2559_v20  ;;  %v2561_v26 = vsel %vm1270_vm4, 1.0, %v3333_v8  ;;  %v2562_v27 = vsel %vm1271_vm5, 1.0, %v3333_v8 }
  0x33   : > { %v2525_v28 = vsel %vm912_vm6, 1.0, %v3333_v8  ;;  %v2526_v29 = vsel %vm913_vm7, 1.0, %v3333_v8  ;;  %v3607_v32 = vsel %vm1272_vm8, 1.0, %v3333_v8  ;;  %v3610_v33 = vsel %vm1273_vm9, 1.0, %v3333_v8 }
  0x34   : > { %3081 = vperm.xlu0 %3028, %v3080_v11   ;;  %vm1274_vm12 = vcmp.eq.s32.totalorder %v3438_v7, 3  ;;  %v3110_v34 = vpack.i.bf16 %v2524_v24, %v2523_v23  ;;  %v3614_v35 = vsel %vm914_vm10, 1.0, %v3333_v8  ;;  %v3617_v36 = vsel %vm915_vm11, 1.0, %v3333_v8 }
  0x35   : > { %vm1275_vm13 = vcmp.eq.s32.totalorder %v3458_v19, 3  ;;  %vm916_vm14 = vcmp.eq.s32.totalorder %v3438_v7, 2  ;;  %vm917_vm15 = vcmp.eq.s32.totalorder %v3458_v19, 2  ;;  %vm1276_vm0 = vcmp.eq.s32.totalorder %v3479_v30, 3 }
  0x36   : > { %3096 = vperm.xlu1 %3039, %v3095_v14   ;;  %vm1277_vm1 = vcmp.eq.s32.totalorder %v3482_v31, 3  ;;  %v3125_v37 = vpack.i.bf16 %v2562_v27, %v2561_v26  ;;  %v3120_v38 = vpack.i.bf16 %v2526_v29, %v2525_v28  ;;  %v3135_v39 = vpack.i.bf16 %v3610_v33, %v3607_v32 }
  0x37   : > { %v3627_v41 = vsel %vm1274_vm12, 1.0, %v3333_v8  ;;  %v3130_v43 = vpack.i.bf16 %v3617_v36, %v3614_v35  ;;  %v3632_v46 = vsel %vm1275_vm13, 1.0, %v3333_v8  ;;  %vm918_vm2 = vcmp.eq.s32.totalorder %v3479_v30, 2 }
  0x38   : > { %3091 = vperm.xlu0 %3028, %v3090_v15   ;;  %vm919_vm3 = vcmp.eq.s32.totalorder %v3482_v31, 2  ;;  %v3637_v47 = vsel %vm916_vm14, 1.0, %v3333_v8  ;;  %v3640_v48 = vsel %vm917_vm15, 1.0, %v3333_v8  ;;  %v3643_v49 = vsel %vm1276_vm0, 1.0, %v3333_v8 }
  0x39   : > { %v3646_v50 = vsel %vm1277_vm1, 1.0, %v3333_v8  ;;  %vm1278_vm4 = vcmp.eq.s32.totalorder %v3501_v40, 3  ;;  %vm1279_vm5 = vcmp.eq.s32.totalorder %v3509_v42, 3  ;;  %vm920_vm6 = vcmp.eq.s32.totalorder %v3501_v40, 2 }
  0x3a   : > { %3106 = vperm.xlu1 %3039, %v3105_v18   ;;  %vm921_vm7 = vcmp.eq.s32.totalorder %v3509_v42, 2  ;;  %v3653_v51 = vsel %vm918_vm2, 1.0, %v3333_v8  ;;  %v3656_v56 = vsel %vm919_vm3, 1.0, %v3333_v8  ;;  %vm1280_vm8 = vcmp.eq.s32.totalorder %v3512_v44, 3 }
  0x3b   : > { %vm1281_vm9 = vcmp.eq.s32.totalorder %v3515_v45, 3  ;;  %v3145_v57 = vpack.i.bf16 %v3632_v46, %v3627_v41  ;;  %v3140_v58 = vpack.i.bf16 %v3640_v48, %v3637_v47  ;;  %vm922_vm10 = vcmp.eq.s32.totalorder %v3512_v44, 2 }
  0x3c   : > { %3101 = vperm.xlu0 %3028, %v3100_v22   ;;  %vm923_vm11 = vcmp.eq.s32.totalorder %v3515_v45, 2  ;;  %v3667_v59 = vsel %vm1278_vm4, 1.0, %v3333_v8  ;;  %v3670_v60 = vsel %vm1279_vm5, 1.0, %v3333_v8  ;;  %v3673_v61 = vsel %vm920_vm6, 1.0, %v3333_v8 }
  0x3d   : > { %v3676_v62 = vsel %vm921_vm7, 1.0, %v3333_v8  ;;  %v3155_v63 = vpack.i.bf16 %v3646_v50, %v3643_v49  ;;  %v3150_v0 = vpack.i.bf16 %v3656_v56, %v3653_v51  ;;  %v3683_v1 = vsel %vm1280_vm8, 1.0, %v3333_v8 }
  0x3e   : > { %3116 = vperm.xlu1 %3039, %v3115_v25   ;;  %v3686_v2 = vsel %vm1281_vm9, 1.0, %v3333_v8  ;;  %v3689_v9 = vsel %vm922_vm10, 1.0, %v3333_v8  ;;  %v3692_v10 = vsel %vm923_vm11, 1.0, %v3333_v8  ;;  %vm1282_vm12 = vcmp.eq.s32.totalorder %v3535_v52, 3 }
  0x3f   : > { %vm1283_vm13 = vcmp.eq.s32.totalorder %v3538_v53, 3  ;;  %v3165_v11 = vpack.i.bf16 %v3670_v60, %v3667_v59  ;;  %v3160_v14 = vpack.i.bf16 %v3676_v62, %v3673_v61  ;;  %vm924_vm14 = vcmp.eq.s32.totalorder %v3535_v52, 2 }
  0x40   : > { %3111 = vperm.xlu0 %3028, %v3110_v34   ;;  %vm1626_vm15 = vcmp.eq.s32.totalorder %v3429_v5, 4  ;;  %v3175_v15 = vpack.i.bf16 %v3686_v2, %v3683_v1  ;;  %vm925_vm0 = vcmp.eq.s32.totalorder %v3538_v53, 2  ;;  %vm1627_vm1 = vcmp.eq.s32.totalorder %v3434_v6, 4 }
  0x41   : > { %v3707_v16 = vsel %vm1626_vm15, 1.0, %v3333_v8  ;;  %v3170_v17 = vpack.i.bf16 %v3692_v10, %v3689_v9  ;;  %v3712_v18 = vsel %vm1282_vm12, 1.0, %v3333_v8  ;;  %v3715_v20 = vsel %vm1283_vm13, 1.0, %v3333_v8 }
  0x42   : > { %3126 = vperm.xlu1 %3039, %v3125_v37   ;;  %v3718_v21 = vsel %vm1627_vm1, 1.0, %v3333_v8  ;;  %v3721_v22 = vsel %vm924_vm14, 1.0, %v3333_v8  ;;  %vm1628_vm2 = vcmp.eq.s32.totalorder %v3446_v12, 4  ;;  %vm1629_vm3 = vcmp.eq.s32.totalorder %v3449_v13, 4 }
  0x43   : > { %v3190_v23 = vpack.i.bf16 %v3718_v21, %v3707_v16  ;;  %v3728_v24 = vsel %vm925_vm0, 1.0, %v3333_v8  ;;  %v3731_v25 = vsel %vm1628_vm2, 1.0, %v3333_v8  ;;  %v3734_v26 = vsel %vm1629_vm3, 1.0, %v3333_v8  ;;  %v3884_v21 = vld [vmem:[%s3870_s8 + $0x18] sm:$0xff] }
  0x44   : > { %3121 = vperm.xlu0 %3028, %v3120_v38   ;;  %vm1988_vm4 = vcmp.eq.s32.totalorder %v3423_v3, 5  ;;  %v3200_v27 = vpack.i.bf16 %v3734_v26, %v3731_v25  ;;  %vm1989_vm5 = vcmp.eq.s32.totalorder %v3426_v4, 5  ;;  %vm1630_vm6 = vcmp.eq.s32.totalorder %v3423_v3, 4  ;;  %v2577_v26 = vld [vmem:[%s4385_s2 + $0x70] sm:$0xff] }
  0x45   : > { %v3741_v28 = vsel %vm1988_vm4, 1.0, %v3333_v8  ;;  %v3745_v29 = vsel %vm1989_vm5, 1.0, %v3333_v8  ;;  %vm1631_vm7 = vcmp.eq.s32.totalorder %v3426_v4, 4  ;;  %v3749_v32 = vsel %vm1630_vm6, 1.0, %v3333_v8 }
  0x46   : > { %3136 = vperm.xlu1 %3039, %v3135_v39   ;;  %vm1990_vm8 = vcmp.eq.s32.totalorder %v3438_v7, 5  ;;  %v3215_v33 = vpack.i.bf16 %v3745_v29, %v3741_v28  ;;  %v3755_v34 = vsel %vm1631_vm7, 1.0, %v3333_v8  ;;  %vm1991_vm9 = vcmp.eq.s32.totalorder %v3458_v19, 5 }
  0x47   : > { %v3759_v3 = vsel %vm1990_vm8, 1.0, %v3333_v8  ;;  %v3210_v4 = vpack.i.bf16 %v3755_v34, %v3749_v32  ;;  %v3764_v35 = vsel %vm1991_vm9, 1.0, %v3333_v8  ;;  %vm1632_vm10 = vcmp.eq.s32.totalorder %v3438_v7, 4  ;;  %v2576_v34 = vld [vmem:[%s4385_s2 + $0x68] sm:$0xff] }
  0x48   : > { %3131 = vperm.xlu0 %3028, %v3130_v43   ;;  %vm1633_vm11 = vcmp.eq.s32.totalorder %v3458_v19, 4  ;;  %v3225_v36 = vpack.i.bf16 %v3764_v35, %v3759_v3  ;;  %v3771_v37 = vsel %vm1632_vm10, 1.0, %v3333_v8  ;;  %vm1992_vm12 = vcmp.eq.s32.totalorder %v3479_v30, 5 }
  0x49   : > { %v3774_v38 = vsel %vm1633_vm11, 1.0, %v3333_v8  ;;  %vm1984_vm13 = vcmp.eq.s32.totalorder %v3429_v5, 5  ;;  %vm1985_vm14 = vcmp.eq.s32.totalorder %v3434_v6, 5  ;;  %vm1993_vm15 = vcmp.eq.s32.totalorder %v3482_v31, 5  ;;  %v3873_v6 = vld [vmem:[%s3870_s8 + $0x8] sm:$0xff] }
  0x4a   : > { %3146 = vperm.xlu1 %3039, %v3145_v57   ;;  %v3220_v7 = vpack.i.bf16 %v3774_v38, %v3771_v37  ;;  %v3783_v19 = vsel %vm1992_vm12, 1.0, %v3333_v8  ;;  %vm1634_vm0 = vcmp.eq.s32.totalorder %v3479_v30, 4  ;;  %v2640_v39 = vsel %vm1993_vm15, 1.0, %v3333_v8  ;;  %v3908_v38 = vld [vmem:[%s3870_s8 + $0x28] sm:$0xff] }
  0x4b   : > { %vm1635_vm1 = vcmp.eq.s32.totalorder %v3482_v31, 4  ;;  %v2603_v41 = vsel %vm1634_vm0, 1.0, %v3333_v8  ;;  %vm1994_vm2 = vcmp.eq.s32.totalorder %v3501_v40, 5  ;;  %v3235_v43 = vpack.i.bf16 %v2640_v39, %v3783_v19  ;;  %v3912_v19 = vld [vmem:[%s3870_s8 + $0x30] sm:$0xff] }
  0x4c   : > { %3141 = vperm.xlu0 %3028, %v3140_v58   ;;  %v2604_v46 = vsel %vm1635_vm1, 1.0, %v3333_v8  ;;  %vm1995_vm3 = vcmp.eq.s32.totalorder %v3509_v42, 5  ;;  %v2641_v30 = vsel %vm1994_vm2, 1.0, %v3333_v8  ;;  %vm1636_vm4 = vcmp.eq.s32.totalorder %v3501_v40, 4 }
  0x4d   : > { %v3230_v31 = vpack.i.bf16 %v2604_v46, %v2603_v41  ;;  %v2642_v47 = vsel %vm1995_vm3, 1.0, %v3333_v8  ;;  %vm1637_vm5 = vcmp.eq.s32.totalorder %v3509_v42, 4  ;;  %v2605_v49 = vsel %vm1636_vm4, 1.0, %v3333_v8 }
  0x4e   : > { %3156 = vperm.xlu1 %3039, %v3155_v63   ;;  %v3245_v48 = vpack.i.bf16 %v2642_v47, %v2641_v30  ;;  %v2606_v50 = vsel %vm1637_vm5, 1.0, %v3333_v8  ;;  %vm1996_vm6 = vcmp.eq.s32.totalorder %v3512_v44, 5  ;;  %vm1997_vm7 = vcmp.eq.s32.totalorder %v3515_v45, 5 }
  0x4f   : > { %v3240_v57 = vpack.i.bf16 %v2606_v50, %v2605_v49  ;;  %v2643_v51 = vsel %vm1996_vm6, 1.0, %v3333_v8  ;;  %vm1638_vm8 = vcmp.eq.s32.totalorder %v3512_v44, 4  ;;  %v2644_v40 = vsel %vm1997_vm7, 1.0, %v3333_v8  ;;  %v2541_v49 = vld [vmem:[%s4385_s2 + $0x50] sm:$0xff] }
  0x50   : > { %3151 = vperm.xlu0 %3028, %v3150_v0   ;;  %vm1639_vm9 = vcmp.eq.s32.totalorder %v3515_v45, 4  ;;  %v2607_v42 = vsel %vm1638_vm8, 1.0, %v3333_v8  ;;  %vm1998_vm10 = vcmp.eq.s32.totalorder %v3535_v52, 5  ;;  %v3255_v56 = vpack.i.bf16 %v2644_v40, %v2643_v51  ;;  %v2540_v51 = vld [vmem:[%s4385_s2 + $0x48] sm:$0xff] }
  0x51   : > { %v2608_v58 = vsel %vm1639_vm9, 1.0, %v3333_v8  ;;  %vm1999_vm11 = vcmp.eq.s32.totalorder %v3538_v53, 5  ;;  %v2645_v44 = vsel %vm1998_vm10, 1.0, %v3333_v8  ;;  %vm1640_vm12 = vcmp.eq.s32.totalorder %v3535_v52, 4 }
  0x52   : > { %3166 = vperm.xlu1 %3039, %v3165_v11   ;;  %v3250_v59 = vpack.i.bf16 %v2608_v58, %v2607_v42  ;;  %v2646_v60 = vsel %vm1999_vm11, 1.0, %v3333_v8  ;;  %vm1641_vm15 = vcmp.eq.s32.totalorder %v3538_v53, 4  ;;  %v2609_v63 = vsel %vm1640_vm12, 1.0, %v3333_v8  ;;  %v3935_v58 = vld [vmem:[%s3870_s8 + $0x40] sm:$0xff] }
  0x53   : > { %v3265_v45 = vpack.i.bf16 %v2646_v60, %v2645_v44  ;;  %v2610_v61 = vsel %vm1641_vm15, 1.0, %v3333_v8  ;;  %v3185_v62 = vpack.i.bf16 %v3715_v20, %v3712_v18  ;;  %v3180_v52 = vpack.i.bf16 %v3728_v24, %v3721_v22  ;;  %v3881_v20 = vld [vmem:[%s3870_s8 + $0x10] sm:$0xff]  ;;  %v3940_v60 = vld [vmem:[%s3870_s8 + $0x48] sm:$0xff] }
  0x54   : > { %3161 = vperm.xlu0 %3028, %v3160_v14   ;;  %v3260_v0 = vpack.i.bf16 %v2610_v61, %v2609_v63  ;;  %v2631_v53 = vsel %vm1984_vm13, 1.0, %v3333_v8  ;;  %v2632_v1 = vsel %vm1985_vm14, 1.0, %v3333_v8  ;;  %vm1986_vm0 = vcmp.eq.s32.totalorder %v3446_v12, 5  ;;  %v3876_v12 = vld [vmem:[%s3870_s8] sm:$0xff] }
  0x55   : > { %vm1987_vm1 = vcmp.eq.s32.totalorder %v3449_v13, 5  ;;  %v3195_v2 = vpack.i.bf16 %v2632_v1, %v2631_v53  ;;  %v2633_v9 = vsel %vm1986_vm0, 1.0, %v3333_v8  ;;  %vm523_vm13 = vcmask 261120  }
  0x56   : > { %3176 = vperm.xlu1 %3039, %v3175_v15   ;;  %v2634_v10 = vsel %vm1987_vm1, 1.0, %v3333_v8 }
  0x57   : > { %v3205_v11 = vpack.i.bf16 %v2634_v10, %v2633_v9  ;;  %v3957_v9 = vld [vmem:[%s3870_s8 + $0x50] sm:$0xff] }
  0x58   : > { %3171 = vperm.xlu0 %3028, %v3170_v17  }
  0x5a   : > { %3186 = vperm.xlu1 %3039, %v3185_v62   ;;  %v2539_v62 = vld [vmem:[%s4385_s2 + $0x40] sm:$0xff] }
  0x5c   : > { %3181 = vperm.xlu0 %3028, %v3180_v52   ;;  %v3951_v52 = vld [vmem:[%s4385_s2 + $0x98] sm:$0xff] }
  0x5e   : > { %3196 = vperm.xlu1 %3039, %v3195_v2  }
  0x60   : > { %3191 = vperm.xlu0 %3028, %v3190_v23  }
  0x62   : > { %3206 = vperm.xlu1 %3039, %v3205_v11   ;;  %v3962_v11 = vld [vmem:[%s4385_s2 + $0xb8] sm:$0xff] }
  0x64   : > { %3201 = vperm.xlu0 %3028, %v3200_v27   ;;  %v3891_v27 = vld [vmem:[%s3870_s8 + $0x20] sm:$0xff] }
  0x66   : > { %3216 = vperm.xlu1 %3039, %v3215_v33  }
  0x68   : > { %3211 = vperm.xlu0 %3028, %v3210_v4  }
  0x6a   : > { %3226 = vperm.xlu1 %3039, %v3225_v36  }
  0x6c   : > { %3221 = vperm.xlu0 %3028, %v3220_v7  }
  0x6e   : > { %3236 = vperm.xlu1 %3039, %v3235_v43  }
  0x70   : > { %3231 = vperm.xlu0 %3028, %v3230_v31   ;;  %v3918_v31 = vld [vmem:[%s3870_s8 + $0x38] sm:$0xff] }
  0x72   : > { %3246 = vperm.xlu1 %3039, %v3245_v48  }
  0x74   : > { %3241 = vperm.xlu0 %3028, %v3240_v57  }
  0x76   : > { %3256 = vperm.xlu1 %3039, %v3255_v56  }
  0x78   : > { %3251 = vperm.xlu0 %3028, %v3250_v59  }
  0x7a   : > { %3266 = vperm.xlu1 %3039, %v3265_v45  }
  0x7c   : > { %3261 = vperm.xlu0 %3028, %v3260_v0  }
  0x99   : > { %v3042_v5 = vpop.permute.xlu1 %3041 }
  0x9a   : > { %v3043_v23 = vunpack.i.l.bf16 %v3042_v5  ;;  %v3044_v4 = vunpack.i.h.bf16 %v3042_v5 }
  0x9b   : > { %v3031_v8 = vpop.permute.xlu0 %3030 }
  0x9c   : > { %v3033_v13 = vunpack.i.h.bf16 %v3031_v8  ;;  %v3032_v14 = vunpack.i.l.bf16 %v3031_v8  ;;  %v358_v35 = vmul.f32 %v3043_v23, %v3891_v27  ;;  %v359_v50 = vmul.f32 %v3044_v4, %v3908_v38 }
  0x9d   : > { %v3047_v16 = vpop.permute.xlu1 %3046 }
  0x9e   : > { %v355_v15 = vmul.f32 %v3033_v13, %v3873_v6  ;;  %v354_v17 = vmul.f32 %v3032_v14, %v3876_v12  ;;  %v3049_v18 = vunpack.i.h.bf16 %v3047_v16  ;;  %v3048_v7 = vunpack.i.l.bf16 %v3047_v16  ;;  %v3966_v13 = vld [vmem:[%s3870_s8 + $0x58] sm:$0xff] }
  0x9f   : > { %v3036_v22 = vpop.permute.xlu0 %3035 }
  0xa0   : > { %v3038_v24 = vunpack.i.h.bf16 %v3036_v22  ;;  %v3037_v25 = vunpack.i.l.bf16 %v3036_v22  ;;  %2833 = vmatprep.mubr.msk.f32.mxu1 %vm523_vm13, %v354_v17  ;;  %v502_v28 = vmul.f32 %v3049_v18, %v3876_v12  ;;  %v360_v57 = vmul.f32 %v3048_v7, %v3912_v19 }
  0xa1   : > { %2834 = vmatmul.mubr.msk.f32.vlgmr.msra.gmra.mxu1 %vm523_vm13, %v355_v15  ;;  %v3057_v33 = vpop.permute.xlu1 %3056 }
  0xa2   : > { %v357_v29 = vmul.f32 %v3038_v24, %v3884_v21  ;;  %v356_v32 = vmul.f32 %v3037_v25, %v3881_v20  ;;  %2890 = vmatpush3.msra.mxu1 %v3552_v55  ;;  %2801 = vmatprep.mubr.msk.f32.mxu0 %vm523_vm13, %v502_v28  ;;  %v2575_v55 = vld [vmem:[%s4385_s2 + $0x60] sm:$0xff]  ;;  %v3058_v39 = vunpack.i.l.bf16 %v3057_v33  ;;  %v3059_v30 = vunpack.i.h.bf16 %v3057_v33 }
  0xa3   : > { %v3052_v3 = vpop.permute.xlu0 %3051  ;;  %2891 = vmatprep.subr.mxu1 %v2577_v26  ;;  %v3978_v24 = vld [vmem:[%s3870_s8 + $0x60] sm:$0xff] }
  0xa4   : > { %v3054_v36 = vunpack.i.h.bf16 %v3052_v3  ;;  %v3053_v37 = vunpack.i.l.bf16 %v3052_v3  ;;  %2836 = vmatprep.mubr.msk.f32.mxu1 %vm523_vm13, %v356_v32  ;;  %2892 = vmatpush3.msra.mxu1 %v2577_v26  ;;  %v505_v40 = vmul.f32 %v3058_v39, %v3884_v21  ;;  %v506_v59 = vmul.f32 %v3059_v30, %v3891_v27 }
  0xa5   : > { %2837 = vmatmul.mubr.msk.f32.gmra.mxu1 %vm523_vm13, %v357_v29  ;;  %2893 = vmatprep.subr.mxu1 %v2576_v34  ;;  %v3067_v46 = vpop.permute.xlu1 %3066  ;;  %v3982_v29 = vld [vmem:[%s3870_s8 + $0x68] sm:$0xff] }
  0xa6   : > { %v504_v41 = vmul.f32 %v3054_v36, %v3881_v20  ;;  %v503_v43 = vmul.f32 %v3053_v37, %v3873_v6  ;;  %2839 = vmatprep.mubr.msk.f32.mxu1 %vm523_vm13, %v358_v35  ;;  %2894 = vmatpush3.msra.mxu1 %v2576_v34  ;;  %v3069_v47 = vunpack.i.h.bf16 %v3067_v46  ;;  %v3068_v53 = vunpack.i.l.bf16 %v3067_v46  ;;  %v3992_v37 = vld [vmem:[%s3870_s8 + $0x70] sm:$0xff] }
  0xa7   : > { %v3062_v48 = vpop.permute.xlu0 %3061  ;;  %2895 = vmatprep.subr.mxu1 %v2575_v55 }
  0xa8   : > { %2802 = vmatmul.mubr.msk.f32.vlgmr.msra.gmra.mxu0 %vm523_vm13, %v503_v43  ;;  %2896 = vmatpush3.msra.mxu1 %v2575_v55  ;;  %v361_v42 = vmul.f32 %v3069_v47, %v3918_v31  ;;  %v3063_v56 = vunpack.i.l.bf16 %v3062_v48  ;;  %v509_v18 = vmul.f32 %v3068_v53, %v3918_v31 }
  0xa9   : > { %2858 = vmatpush3.msra.mxu0 %v3543_v54  ;;  %2804 = vmatprep.mubr.msk.f32.mxu0 %vm523_vm13, %v504_v41  ;;  %v3077_v44 = vpop.permute.xlu1 %3076  ;;  %v3064_v54 = vunpack.i.h.bf16 %v3062_v48  ;;  %v3996_v41 = vld [vmem:[%s3870_s8 + $0x78] sm:$0xff]  ;;  %s4335_s8 = scalar_lea.hbm %s4386_s3, %s2672_s4 }
  0xaa   : > { %2840 = vmatmul.mubr.msk.f32.gmra.mxu1 %vm523_vm13, %v359_v50  ;;  %2859 = vmatprep.subr.mxu0 %v2541_v49  ;;  %v3079_v45 = vunpack.i.h.bf16 %v3077_v44  ;;  %v3078_v63 = vunpack.i.l.bf16 %v3077_v44  ;;  %v507_v1 = vmul.f32 %v3063_v56, %v3908_v38 }
  0xab   : > { %2842 = vmatprep.mubr.msk.f32.mxu1 %vm523_vm13, %v360_v57  ;;  %v3072_v61 = vpop.permute.xlu0 %3071  ;;  %2860 = vmatpush3.msra.mxu0 %v2541_v49  ;;  %v508_v5 = vmul.f32 %v3064_v54, %v3912_v19 }
  0xac   : > { %2805 = vmatmul.mubr.msk.f32.gmra.mxu0 %vm523_vm13, %v505_v40  ;;  %2861 = vmatprep.subr.mxu0 %v2540_v51  ;;  %v362_v0 = vmul.f32 %v3078_v63, %v3935_v58  ;;  %v363_v2 = vmul.f32 %v3079_v45, %v3940_v60  ;;  %v3073_v8 = vunpack.i.l.bf16 %v3072_v61  ;;  %v3074_v22 = vunpack.i.h.bf16 %v3072_v61 }
  0xad   : > { %2807 = vmatprep.mubr.msk.f32.mxu0 %vm523_vm13, %v506_v59  ;;  %2862 = vmatpush3.msra.mxu0 %v2540_v51  ;;  %v3087_v10 = vpop.permute.xlu1 %3086 }
  0xae   : > { %2843 = vmatmul.mubr.msk.f32.gmra.mxu1 %vm523_vm13, %v361_v42  ;;  %2863 = vmatprep.subr.mxu0 %v2539_v62  ;;  %v3089_v14 = vunpack.i.h.bf16 %v3087_v10  ;;  %v3088_v15 = vunpack.i.l.bf16 %v3087_v10  ;;  %v510_v26 = vmul.f32 %v3073_v8, %v3935_v58  ;;  %v511_v4 = vmul.f32 %v3074_v22, %v3940_v60 }
  0xaf   : > { %v3082_v16 = vpop.permute.xlu0 %3081  ;;  %2845 = vmatprep.mubr.msk.f32.mxu1 %vm523_vm13, %v362_v0  ;;  %2864 = vmatpush3.msra.mxu0 %v2539_v62 }
  0xb0   : > { %2808 = vmatmul.mubr.msk.f32.gmra.mxu0 %vm523_vm13, %v507_v1  ;;  %2921 = vmatprep.subr.mxu0 %v3951_v52  ;;  %v364_v17 = vmul.f32 %v3088_v15, %v3957_v9  ;;  %v365_v23 = vmul.f32 %v3089_v14, %v3966_v13  ;;  %v3083_v28 = vunpack.i.l.bf16 %v3082_v16  ;;  %v3084_v35 = vunpack.i.h.bf16 %v3082_v16 }
  0xb1   : > { %2810 = vmatprep.mubr.msk.f32.mxu0 %vm523_vm13, %v508_v5  ;;  %2953 = vmatprep.subr.mxu1 %v3962_v11  ;;  %v3097_v25 = vpop.permute.xlu1 %3096  ;;  %v2649_v5 = vld [vmem:[%s4385_s2 + $0xb0] sm:$0xff] }
  0xb2   : > { %2846 = vmatmul.mubr.msk.f32.gmra.mxu1 %vm523_vm13, %v363_v2  ;;  %v3099_v32 = vunpack.i.h.bf16 %v3097_v25  ;;  %v3098_v33 = vunpack.i.l.bf16 %v3097_v25  ;;  %v512_v7 = vmul.f32 %v3083_v28, %v3957_v9  ;;  %v513_v48 = vmul.f32 %v3084_v35, %v3966_v13 }
  0xb3   : > { %v3092_v34 = vpop.permute.xlu0 %3091  ;;  %2848 = vmatprep.mubr.msk.f32.mxu1 %vm523_vm13, %v364_v17 }
  0xb4   : > { %2811 = vmatmul.mubr.msk.f32.gmra.mxu0 %vm523_vm13, %v509_v18  ;;  %v366_v3 = vmul.f32 %v3098_v33, %v3978_v24  ;;  %v367_v36 = vmul.f32 %v3099_v32, %v3982_v29  ;;  %v3093_v39 = vunpack.i.l.bf16 %v3092_v34  ;;  %v3094_v49 = vunpack.i.h.bf16 %v3092_v34  ;;  %v2647_v32 = vld [vmem:[%s4385_s2 + $0xa0] sm:$0xff] }
  0xb5   : > { %2813 = vmatprep.mubr.msk.f32.mxu0 %vm523_vm13, %v510_v26  ;;  %v3107_v55 = vpop.permute.xlu1 %3106  ;;  %v2648_v26 = vld [vmem:[%s4385_s2 + $0xa8] sm:$0xff] }
  0xb6   : > { %2849 = vmatmul.mubr.msk.f32.gmra.mxu1 %vm523_vm13, %v365_v23  ;;  %v3109_v43 = vunpack.i.h.bf16 %v3107_v55  ;;  %v3108_v46 = vunpack.i.l.bf16 %v3107_v55  ;;  %v514_v51 = vmul.f32 %v3093_v39, %v3978_v24  ;;  %v515_v54 = vmul.f32 %v3094_v49, %v3982_v29  ;;  %v2613_v39 = vld [vmem:[%s4385_s2 + $0x90] sm:$0xff] }
  0xb7   : > { %v3102_v30 = vpop.permute.xlu0 %3101  ;;  %2851 = vmatprep.mubr.msk.f32.mxu1 %vm523_vm13, %v366_v3 }
  0xb8   : > { %2814 = vmatmul.mubr.msk.f32.gmra.mxu0 %vm523_vm13, %v511_v4  ;;  %v368_v47 = vmul.f32 %v3108_v46, %v3992_v37  ;;  %v369_v50 = vmul.f32 %v3109_v43, %v3996_v41  ;;  %v3103_v40 = vunpack.i.l.bf16 %v3102_v30  ;;  %v3104_v45 = vunpack.i.h.bf16 %v3102_v30  ;;  %v2612_v46 = vld [vmem:[%s4385_s2 + $0x88] sm:$0xff] }
  0xb9   : > { %2816 = vmatprep.mubr.msk.f32.mxu0 %vm523_vm13, %v512_v7  ;;  %v3117_v57 = vpop.permute.xlu1 %3116 }
  0xba   : > { %2852 = vmatmul.mubr.msk.f32.gmra.mxu1 %vm523_vm13, %v367_v36  ;;  %v3119_v42 = vunpack.i.h.bf16 %v3117_v57  ;;  %v3118_v56 = vunpack.i.l.bf16 %v3117_v57  ;;  %v516_v62 = vmul.f32 %v3103_v40, %v3992_v37  ;;  %v517_v8 = vmul.f32 %v3104_v45, %v3996_v41 }
  0xbb   : > { %v3112_v44 = vpop.permute.xlu0 %3111  ;;  %2854 = vmatprep.mubr.msk.f32.mxu1 %vm523_vm13, %v368_v47 }
  0xbc   : > { %2817 = vmatmul.mubr.msk.f32.gmra.mxu0 %vm523_vm13, %v513_v48  ;;  %v1396_v59 = vmul.f32 %v3118_v56, %v3876_v12  ;;  %v1397_v63 = vmul.f32 %v3119_v42, %v3873_v6  ;;  %v3113_v0 = vunpack.i.l.bf16 %v3112_v44  ;;  %v3114_v14 = vunpack.i.h.bf16 %v3112_v44  ;;  %v2611_v42 = vld [vmem:[%s4385_s2 + $0x80] sm:$0xff] }
  0xbd   : > { %2819 = vmatprep.mubr.msk.f32.mxu0 %vm523_vm13, %v514_v51  ;;  %v3127_v61 = vpop.permute.xlu1 %3126 }
  0xbe   : > { %2855 = vmatmul.mubr.msk.f32.gmra.mxu1 %vm523_vm13, %v369_v50  ;;  %v3129_v53 = vunpack.i.h.bf16 %v3127_v61  ;;  %v3128_v1 = vunpack.i.l.bf16 %v3127_v61  ;;  %v1038_v17 = vmul.f32 %v3113_v0, %v3876_v12  ;;  %v1039_v33 = vmul.f32 %v3114_v14, %v3873_v6 }
  0xbf   : > { %v3122_v2 = vpop.permute.xlu0 %3121  ;;  %2897 = vmatprep.mubr.msk.f32.mxu1 %vm523_vm13, %v1396_v59 }
  0xc0   : > { %2820 = vmatmul.mubr.msk.f32.gmra.mxu0 %vm523_vm13, %v515_v54  ;;  %v1398_v10 = vmul.f32 %v3128_v1, %v3881_v20  ;;  %v1399_v15 = vmul.f32 %v3129_v53, %v3884_v21  ;;  %v3123_v18 = vunpack.i.l.bf16 %v3122_v2  ;;  %v3124_v34 = vunpack.i.h.bf16 %v3122_v2 }
  0xc1   : > { %2822 = vmatprep.mubr.msk.f32.mxu0 %vm523_vm13, %v516_v62  ;;  %v3137_v16 = vpop.permute.xlu1 %3136 }
  0xc2   : > { %2898 = vmatmul.mubr.msk.f32.vlgmr.msra.gmra.mxu1 %vm523_vm13, %v1397_v63  ;;  %v3139_v22 = vunpack.i.h.bf16 %v3137_v16  ;;  %v3138_v23 = vunpack.i.l.bf16 %v3137_v16  ;;  %v1040_v4 = vmul.f32 %v3123_v18, %v3881_v20  ;;  %v1041_v30 = vmul.f32 %v3124_v34, %v3884_v21 }
  0xc3   : > { %v3132_v25 = vpop.permute.xlu0 %3131  ;;  %2900 = vmatprep.mubr.msk.f32.mxu1 %vm523_vm13, %v1398_v10  ;;  %2954 = vmatpush3.msra.mxu1 %v3962_v11 }
  0xc4   : > { %2823 = vmatmul.mubr.msk.f32.gmra.mxu0 %vm523_vm13, %v517_v8  ;;  %2955 = vmatprep.subr.mxu1 %v2649_v5  ;;  %v1400_v28 = vmul.f32 %v3138_v23, %v3891_v27  ;;  %v1401_v11 = vmul.f32 %v3139_v22, %v3908_v38  ;;  %v3133_v35 = vunpack.i.l.bf16 %v3132_v25  ;;  %v3134_v47 = vunpack.i.h.bf16 %v3132_v25 }
  0xc5   : > { %2865 = vmatprep.mubr.msk.f32.mxu0 %vm523_vm13, %v1038_v17  ;;  %2956 = vmatpush3.msra.mxu1 %v2649_v5  ;;  %v3147_v3 = vpop.permute.xlu1 %3146 }
  0xc6   : > { %2901 = vmatmul.mubr.msk.f32.gmra.mxu1 %vm523_vm13, %v1399_v15  ;;  %2957 = vmatprep.subr.mxu1 %v2648_v26  ;;  %v3149_v36 = vunpack.i.h.bf16 %v3147_v3  ;;  %v3148_v55 = vunpack.i.l.bf16 %v3147_v3  ;;  %v1042_v50 = vmul.f32 %v3133_v35, %v3891_v27  ;;  %v1043_v44 = vmul.f32 %v3134_v47, %v3908_v38 }
  0xc7   : > { %v3142_v7 = vpop.permute.xlu0 %3141  ;;  %2903 = vmatprep.mubr.msk.f32.mxu1 %vm523_vm13, %v1400_v28  ;;  %2958 = vmatpush3.msra.mxu1 %v2648_v26 }
  0xc8   : > { %2866 = vmatmul.mubr.msk.f32.vlgmr.msra.gmra.mxu0 %vm523_vm13, %v1039_v33  ;;  %2959 = vmatprep.subr.mxu1 %v2647_v32  ;;  %v1402_v43 = vmul.f32 %v3148_v55, %v3912_v19  ;;  %v1403_v48 = vmul.f32 %v3149_v36, %v3918_v31  ;;  %v3143_v57 = vunpack.i.l.bf16 %v3142_v7  ;;  %v3144_v59 = vunpack.i.h.bf16 %v3142_v7 }
  0xc9   : > { %2922 = vmatpush3.msra.mxu0 %v3951_v52  ;;  %2868 = vmatprep.mubr.msk.f32.mxu0 %vm523_vm13, %v1040_v4  ;;  %v3157_v49 = vpop.permute.xlu1 %3156 }
  0xca   : > { %2904 = vmatmul.mubr.msk.f32.gmra.mxu1 %vm523_vm13, %v1401_v11  ;;  %2923 = vmatprep.subr.mxu0 %v2613_v39  ;;  %v3159_v51 = vunpack.i.h.bf16 %v3157_v49  ;;  %v3158_v52 = vunpack.i.l.bf16 %v3157_v49  ;;  %v1044_v63 = vmul.f32 %v3143_v57, %v3912_v19  ;;  %v1045_v2 = vmul.f32 %v3144_v59, %v3918_v31 }
  0xcb   : > { %v3152_v40 = vpop.permute.xlu0 %3151  ;;  %2906 = vmatprep.mubr.msk.f32.mxu1 %vm523_vm13, %v1402_v43  ;;  %2924 = vmatpush3.msra.mxu0 %v2613_v39 }
  0xcc   : > { %2869 = vmatmul.mubr.msk.f32.gmra.mxu0 %vm523_vm13, %v1041_v30  ;;  %2925 = vmatprep.subr.mxu0 %v2612_v46  ;;  %v1404_v56 = vmul.f32 %v3158_v52, %v3935_v58  ;;  %v1405_v54 = vmul.f32 %v3159_v51, %v3940_v60  ;;  %v3153_v61 = vunpack.i.l.bf16 %v3152_v40  ;;  %v3154_v10 = vunpack.i.h.bf16 %v3152_v40 }
  0xcd   : > { %2871 = vmatprep.mubr.msk.f32.mxu0 %vm523_vm13, %v1042_v50  ;;  %2926 = vmatpush3.msra.mxu0 %v2612_v46  ;;  %v3167_v45 = vpop.permute.xlu1 %3166 }
  0xce   : > { %2907 = vmatmul.mubr.msk.f32.gmra.mxu1 %vm523_vm13, %v1403_v48  ;;  %2927 = vmatprep.subr.mxu0 %v2611_v42  ;;  %v3169_v62 = vunpack.i.h.bf16 %v3167_v45  ;;  %v3168_v0 = vunpack.i.l.bf16 %v3167_v45  ;;  %v1046_v14 = vmul.f32 %v3153_v61, %v3935_v58  ;;  %v1047_v23 = vmul.f32 %v3154_v10, %v3940_v60 }
  0xcf   : > { %v3162_v53 = vpop.permute.xlu0 %3161  ;;  %2909 = vmatprep.mubr.msk.f32.mxu1 %vm523_vm13, %v1404_v56  ;;  %2928 = vmatpush3.msra.mxu0 %v2611_v42 }
  0xd0   : > { %2872 = vmatmul.mubr.msk.f32.gmra.mxu0 %vm523_vm13, %v1043_v44  ;;  %2960 = vmatpush3.msra.mxu1 %v2647_v32  ;;  %v1406_v1 = vmul.f32 %v3168_v0, %v3957_v9  ;;  %v1407_v5 = vmul.f32 %v3169_v62, %v3966_v13  ;;  %v3163_v15 = vunpack.i.l.bf16 %v3162_v53  ;;  %v3164_v25 = vunpack.i.h.bf16 %v3162_v53 }
  0xd1   : > { %2874 = vmatprep.mubr.msk.f32.mxu0 %vm523_vm13, %v1044_v63  ;;  %v3177_v8 = vpop.permute.xlu1 %3176 }
  0xd2   : > { %2910 = vmatmul.mubr.msk.f32.gmra.mxu1 %vm523_vm13, %v1405_v54  ;;  %v3179_v16 = vunpack.i.h.bf16 %v3177_v8  ;;  %v3178_v17 = vunpack.i.l.bf16 %v3177_v8  ;;  %v1048_v32 = vmul.f32 %v3163_v15, %v3957_v9  ;;  %v1049_v35 = vmul.f32 %v3164_v25, %v3966_v13 }
  0xd3   : > { %v3172_v18 = vpop.permute.xlu0 %3171  ;;  %2912 = vmatprep.mubr.msk.f32.mxu1 %vm523_vm13, %v1406_v1 }
  0xd4   : > { %2875 = vmatmul.mubr.msk.f32.gmra.mxu0 %vm523_vm13, %v1045_v2  ;;  %v1408_v22 = vmul.f32 %v3178_v17, %v3978_v24  ;;  %v1409_v26 = vmul.f32 %v3179_v16, %v3982_v29  ;;  %v3173_v33 = vunpack.i.l.bf16 %v3172_v18  ;;  %v3174_v36 = vunpack.i.h.bf16 %v3172_v18 }
  0xd5   : > { %2877 = vmatprep.mubr.msk.f32.mxu0 %vm523_vm13, %v1046_v14  ;;  %v3187_v28 = vpop.permute.xlu1 %3186 }
  0xd6   : > { %2913 = vmatmul.mubr.msk.f32.gmra.mxu1 %vm523_vm13, %v1407_v5  ;;  %v3189_v34 = vunpack.i.h.bf16 %v3187_v28  ;;  %v3188_v11 = vunpack.i.l.bf16 %v3187_v28  ;;  %v1050_v39 = vmul.f32 %v3173_v33, %v3978_v24  ;;  %v1051_v49 = vmul.f32 %v3174_v36, %v3982_v29 }
  0xd7   : > { %v3182_v3 = vpop.permute.xlu0 %3181  ;;  %2915 = vmatprep.mubr.msk.f32.mxu1 %vm523_vm13, %v1408_v22 }
  0xd8   : > { %2878 = vmatmul.mubr.msk.f32.gmra.mxu0 %vm523_vm13, %v1047_v23  ;;  %v1410_v4 = vmul.f32 %v3188_v11, %v3992_v37  ;;  %v1411_v55 = vmul.f32 %v3189_v34, %v3996_v41  ;;  %v3183_v43 = vunpack.i.l.bf16 %v3182_v3  ;;  %v3184_v50 = vunpack.i.h.bf16 %v3182_v3 }
  0xd9   : > { %2880 = vmatprep.mubr.msk.f32.mxu0 %vm523_vm13, %v1048_v32  ;;  %v3197_v7 = vpop.permute.xlu1 %3196 }
  0xda   : > { %2916 = vmatmul.mubr.msk.f32.gmra.mxu1 %vm523_vm13, %v1409_v26  ;;  %v3199_v46 = vunpack.i.h.bf16 %v3197_v7  ;;  %v3198_v30 = vunpack.i.l.bf16 %v3197_v7  ;;  %v1052_v52 = vmul.f32 %v3183_v43, %v3992_v37  ;;  %v1053_v54 = vmul.f32 %v3184_v50, %v3996_v41 }
  0xdb   : > { %v3192_v47 = vpop.permute.xlu0 %3191  ;;  %2918 = vmatprep.mubr.msk.f32.mxu1 %vm523_vm13, %v1410_v4 }
  0xdc   : > { %2881 = vmatmul.mubr.msk.f32.gmra.mxu0 %vm523_vm13, %v1049_v35  ;;  %v2112_v48 = vmul.f32 %v3198_v30, %v3876_v12  ;;  %v2113_v57 = vmul.f32 %v3199_v46, %v3873_v6  ;;  %v3193_v40 = vunpack.i.l.bf16 %v3192_v47  ;;  %v3194_v45 = vunpack.i.h.bf16 %v3192_v47 }
  0xdd   : > { %2883 = vmatprep.mubr.msk.f32.mxu0 %vm523_vm13, %v1050_v39  ;;  %v3207_v51 = vpop.permute.xlu1 %3206 }
  0xde   : > { %2919 = vmatmul.mubr.msk.f32.gmra.mxu1 %vm523_vm13, %v1411_v55  ;;  %v3209_v42 = vunpack.i.h.bf16 %v3207_v51  ;;  %v3208_v56 = vunpack.i.l.bf16 %v3207_v51  ;;  %v1754_v62 = vmul.f32 %v3193_v40, %v3876_v12  ;;  %v1755_v5 = vmul.f32 %v3194_v45, %v3873_v6 }
  0xdf   : > { %v3202_v44 = vpop.permute.xlu0 %3201  ;;  %2961 = vmatprep.mubr.msk.f32.mxu1 %vm523_vm13, %v2112_v48 }
  0xe0   : > { %2884 = vmatmul.mubr.msk.f32.gmra.mxu0 %vm523_vm13, %v1051_v49  ;;  %v2114_v59 = vmul.f32 %v3208_v56, %v3881_v20  ;;  %v2115_v63 = vmul.f32 %v3209_v42, %v3884_v21  ;;  %v3203_v0 = vunpack.i.l.bf16 %v3202_v44  ;;  %v3204_v8 = vunpack.i.h.bf16 %v3202_v44 }
  0xe1   : > { %2886 = vmatprep.mubr.msk.f32.mxu0 %vm523_vm13, %v1052_v52  ;;  %v3217_v61 = vpop.permute.xlu1 %3216 }
  0xe2   : > { %2962 = vmatmul.mubr.msk.f32.vlgmr.msra.gmra.mxu1 %vm523_vm13, %v2113_v57  ;;  %v3219_v53 = vunpack.i.h.bf16 %v3217_v61  ;;  %v3218_v1 = vunpack.i.l.bf16 %v3217_v61  ;;  %v1756_v15 = vmul.f32 %v3203_v0, %v3881_v20  ;;  %v1757_v6 = vmul.f32 %v3204_v8, %v3884_v21 }
  0xe3   : > { %v3212_v2 = vpop.permute.xlu0 %3211  ;;  %2964 = vmatprep.mubr.msk.f32.mxu1 %vm523_vm13, %v2114_v59 }
  0xe4   : > { %2887 = vmatmul.mubr.msk.f32.gmra.mxu0 %vm523_vm13, %v1053_v54  ;;  %v2116_v10 = vmul.f32 %v3218_v1, %v3891_v27  ;;  %v2117_v14 = vmul.f32 %v3219_v53, %v3908_v38  ;;  %v3213_v16 = vunpack.i.l.bf16 %v3212_v2  ;;  %v3214_v25 = vunpack.i.h.bf16 %v3212_v2 }
  0xe5   : > { %2929 = vmatprep.mubr.msk.f32.mxu0 %vm523_vm13, %v1754_v62  ;;  %v3227_v12 = vpop.permute.xlu1 %3226 }
  0xe6   : > { %2965 = vmatmul.mubr.msk.f32.gmra.mxu1 %vm523_vm13, %v2115_v63  ;;  %v3229_v17 = vunpack.i.h.bf16 %v3227_v12  ;;  %v3228_v18 = vunpack.i.l.bf16 %v3227_v12  ;;  %v1758_v28 = vmul.f32 %v3213_v16, %v3891_v27  ;;  %v1759_v21 = vmul.f32 %v3214_v25, %v3908_v38 }
  0xe7   : > { %v3222_v22 = vpop.permute.xlu0 %3221  ;;  %2967 = vmatprep.mubr.msk.f32.mxu1 %vm523_vm13, %v2116_v10 }
  0xe8   : > { %2930 = vmatmul.mubr.msk.f32.vlgmr.msra.gmra.mxu0 %vm523_vm13, %v1755_v5  ;;  %v2118_v23 = vmul.f32 %v3228_v18, %v3912_v19  ;;  %v2119_v26 = vmul.f32 %v3229_v17, %v3918_v31  ;;  %v3223_v32 = vunpack.i.l.bf16 %v3222_v22  ;;  %v3224_v4 = vunpack.i.h.bf16 %v3222_v22 }
  0xe9   : > { %2932 = vmatprep.mubr.msk.f32.mxu0 %vm523_vm13, %v1756_v15  ;;  %v3237_v20 = vpop.permute.xlu1 %3236 }
  0xea   : > { %2968 = vmatmul.mubr.msk.f32.gmra.mxu1 %vm523_vm13, %v2117_v14  ;;  %v3239_v33 = vunpack.i.h.bf16 %v3237_v20  ;;  %v3238_v34 = vunpack.i.l.bf16 %v3237_v20  ;;  %v1760_v36 = vmul.f32 %v3223_v32, %v3912_v19  ;;  %v1761_v38 = vmul.f32 %v3224_v4, %v3918_v31 }
  0xeb   : > { %v3232_v11 = vpop.permute.xlu0 %3231  ;;  %2970 = vmatprep.mubr.msk.f32.mxu1 %vm523_vm13, %v2118_v23 }
  0xec   : > { %2933 = vmatmul.mubr.msk.f32.gmra.mxu0 %vm523_vm13, %v1757_v6  ;;  %v2120_v3 = vmul.f32 %v3238_v34, %v3935_v58  ;;  %v2121_v35 = vmul.f32 %v3239_v33, %v3940_v60  ;;  %v3233_v55 = vunpack.i.l.bf16 %v3232_v11  ;;  %v3234_v30 = vunpack.i.h.bf16 %v3232_v11 }
  0xed   : > { %2935 = vmatprep.mubr.msk.f32.mxu0 %vm523_vm13, %v1758_v28  ;;  %v3247_v27 = vpop.permute.xlu1 %3246 }
  0xee   : > { %2971 = vmatmul.mubr.msk.f32.gmra.mxu1 %vm523_vm13, %v2119_v26  ;;  %v3249_v7 = vunpack.i.h.bf16 %v3247_v27  ;;  %v3248_v39 = vunpack.i.l.bf16 %v3247_v27  ;;  %v1762_v48 = vmul.f32 %v3233_v55, %v3935_v58  ;;  %v1763_v31 = vmul.f32 %v3234_v30, %v3940_v60 }
  0xef   : > { %v3242_v43 = vpop.permute.xlu0 %3241  ;;  %2973 = vmatprep.mubr.msk.f32.mxu1 %vm523_vm13, %v2120_v3 }
  0xf0   : > { %2936 = vmatmul.mubr.msk.f32.gmra.mxu0 %vm523_vm13, %v1759_v21  ;;  %v2122_v46 = vmul.f32 %v3248_v39, %v3957_v9  ;;  %v2123_v47 = vmul.f32 %v3249_v7, %v3966_v13  ;;  %v3243_v49 = vunpack.i.l.bf16 %v3242_v43  ;;  %v3244_v40 = vunpack.i.h.bf16 %v3242_v43 }
  0xf1   : > { %2938 = vmatprep.mubr.msk.f32.mxu0 %vm523_vm13, %v1760_v36  ;;  %v3257_v19 = vpop.permute.xlu1 %3256 }
  0xf2   : > { %2974 = vmatmul.mubr.msk.f32.gmra.mxu1 %vm523_vm13, %v2121_v35  ;;  %v3259_v50 = vunpack.i.h.bf16 %v3257_v19  ;;  %v3258_v57 = vunpack.i.l.bf16 %v3257_v19  ;;  %v1764_v56 = vmul.f32 %v3243_v49, %v3957_v9  ;;  %v1765_v60 = vmul.f32 %v3244_v40, %v3966_v13 }
  0xf3   : > { %v3252_v51 = vpop.permute.xlu0 %3251  ;;  %2976 = vmatprep.mubr.msk.f32.mxu1 %vm523_vm13, %v2122_v46 }
  0xf4   : > { %2939 = vmatmul.mubr.msk.f32.gmra.mxu0 %vm523_vm13, %v1761_v38  ;;  %v2124_v52 = vmul.f32 %v3258_v57, %v3978_v24  ;;  %v2125_v42 = vmul.f32 %v3259_v50, %v3982_v29  ;;  %v3253_v44 = vunpack.i.l.bf16 %v3252_v51  ;;  %v3254_v61 = vunpack.i.h.bf16 %v3252_v51 }
  0xf5   : > { %2941 = vmatprep.mubr.msk.f32.mxu0 %vm523_vm13, %v1762_v48  ;;  %v3267_v58 = vpop.permute.xlu1 %3266 }
  0xf6   : > { %2977 = vmatmul.mubr.msk.f32.gmra.mxu1 %vm523_vm13, %v2123_v47  ;;  %v3269_v59 = vunpack.i.h.bf16 %v3267_v58  ;;  %v3268_v54 = vunpack.i.l.bf16 %v3267_v58  ;;  %v1766_v9 = vmul.f32 %v3253_v44, %v3978_v24  ;;  %v1767_v53 = vmul.f32 %v3254_v61, %v3982_v29 }
  0xf7   : > { %2979 = vmatprep.mubr.msk.f32.mxu1 %vm523_vm13, %v2124_v52  ;;  %v3262_v45 = vpop.permute.xlu0 %3261 }
  0xf8   : > { %2942 = vmatmul.mubr.msk.f32.gmra.mxu0 %vm523_vm13, %v1763_v31  ;;  %v2126_v63 = vmul.f32 %v3268_v54, %v3992_v37  ;;  %v2127_v62 = vmul.f32 %v3269_v59, %v3996_v41  ;;  %v3263_v0 = vunpack.i.l.bf16 %v3262_v45  ;;  %v3264_v1 = vunpack.i.h.bf16 %v3262_v45 }
  0xf9   : > { %2944 = vmatprep.mubr.msk.f32.mxu0 %vm523_vm13, %v1764_v56 }
  0xfa   : > { %2980 = vmatmul.mubr.msk.f32.gmra.mxu1 %vm523_vm13, %v2125_v42  ;;  %v1768_v13 = vmul.f32 %v3263_v0, %v3992_v37  ;;  %v1769_v24 = vmul.f32 %v3264_v1, %v3996_v41 }
  0xfb   : > { %2982 = vmatprep.mubr.msk.f32.mxu1 %vm523_vm13, %v2126_v63 }
  0xfc   : > { %2945 = vmatmul.mubr.msk.f32.gmra.mxu0 %vm523_vm13, %v1765_v60 }
  0xfd   : > { %2947 = vmatprep.mubr.msk.f32.mxu0 %vm523_vm13, %v1766_v9 }
  0xfe   : > { %2983 = vmatmul.mubr.msk.f32.gmra.mxu1 %vm523_vm13, %v2127_v62 }
 0x100   : > { %2948 = vmatmul.mubr.msk.f32.gmra.mxu0 %vm523_vm13, %v1767_v53 }
 0x101   : > { %2950 = vmatprep.mubr.msk.f32.mxu0 %vm523_vm13, %v1768_v13 }
 0x104   : > { %2951 = vmatmul.mubr.msk.f32.gmra.mxu0 %vm523_vm13, %v1769_v24 }
 0x161   : > { %v2835_v2 = vpop.f32.mrf.mxu1 }
 0x163   : > { %v4164_v10 = vpop.f32.mrf.mxu1 }
 0x165   : > { %v4166_v5 = vpop.f32.mrf.mxu1 }
 0x167   : > { %v4168_v8 = vpop.f32.mrf.mxu1 }
 0x168   : > { %v2803_v29 = vpop.f32.mrf.mxu0 }
 0x169   : > { %v837_v1 = vadd.f32 %v2835_v2, %v2803_v29 }
 0x16a   : > { %v4170_v14 = vpop.f32.mrf.mxu1  ;;  %v638_v12 = vpop.f32.mrf.mxu0 }
 0x16c   : > { %v4172_v37 = vpop.f32.mrf.mxu1  ;;  %v2806_v15 = vpop.f32.mrf.mxu0 }
 0x16e   : > { %v4174_v16 = vpop.f32.mrf.mxu1  ;;  %v4176_v17 = vpop.f32.mrf.mxu0 }
 0x170   : > { %v4178_v41 = vpop.f32.mrf.mxu1  ;;  %v4180_v18 = vpop.f32.mrf.mxu0 }
 0x172   : > { %v4182_v22 = vpop.f32.mrf.mxu1  ;;  %v4184_v23 = vpop.f32.mrf.mxu0 }
 0x174   : > { %v4186_v6 = vpop.f32.mrf.mxu1  ;;  %v4188_v25 = vpop.f32.mrf.mxu0 }
 0x176   : > { %v4190_v26 = vpop.f32.mrf.mxu1  ;;  %v4192_v20 = vpop.f32.mrf.mxu0 }
 0x178   : > { %v4194_v28 = vpop.f32.mrf.mxu1  ;;  %v4196_v32 = vpop.f32.mrf.mxu0 }
 0x17a   : > { %v4198_v33 = vpop.f32.mrf.mxu1  ;;  %v4200_v34 = vpop.f32.mrf.mxu0 }
 0x17c   : > { %v4202_v11 = vpop.f32.mrf.mxu1  ;;  %v4204_v3 = vpop.f32.mrf.mxu0 }
 0x17e   : > { %v4206_v21 = vpop.f32.mrf.mxu1  ;;  %v4208_v4 = vpop.f32.mrf.mxu0 }
 0x17f   : > { %4389 = vst [vmem:[#allocation5_spill] sm:$0xff] %v4206_v21 }
 0x180   : > { %v4210_v35 = vpop.f32.mrf.mxu1  ;;  %v4212_v27 = vpop.f32.mrf.mxu0 }
 0x181   : > { %4390 = vst [vmem:[#allocation6_spill] sm:$0xff] %v4210_v35 }
 0x182   : > { %v2899_v36 = vpop.f32.mrf.mxu1  ;;  %v4214_v55 = vpop.f32.mrf.mxu0 }
 0x184   : > { %v1531_v7 = vpop.f32.mrf.mxu1  ;;  %v4216_v39 = vpop.f32.mrf.mxu0 }
 0x185   : > { %4391 = vst [vmem:[#allocation7_spill] sm:$0xff] %v4216_v39 }
 0x186   : > { %v2902_v43 = vpop.f32.mrf.mxu1  ;;  %v4218_v46 = vpop.f32.mrf.mxu0 }
 0x187   : > { %4392 = vst [vmem:[#allocation8_spill] sm:$0xff] %v4218_v46 }
 0x188   : > { %v4220_v38 = vpop.f32.mrf.mxu1  ;;  %v2867_v30 = vpop.f32.mrf.mxu0 }
 0x189   : > { %v1253_v35 = vadd.f32 %v2867_v30, %v837_v1 }
 0x18a   : > { %v4222_v47 = vpop.f32.mrf.mxu1  ;;  %v1173_v19 = vpop.f32.mrf.mxu0 }
 0x18b   : > { %v1611_v29 = vadd.f32 %v2899_v36, %v1253_v35  ;;  %v867_v35 = vadd.f32 %v4174_v16, %v4188_v25 }
 0x18c   : > { %v4224_v48 = vpop.f32.mrf.mxu1  ;;  %v2870_v49 = vpop.f32.mrf.mxu0 }
 0x18e   : > { %v4226_v50 = vpop.f32.mrf.mxu1  ;;  %v1183_v57 = vpop.f32.mrf.mxu0 }
 0x190   : > { %v4228_v51 = vpop.f32.mrf.mxu1  ;;  %v2873_v52 = vpop.f32.mrf.mxu0 }
 0x192   : > { %v4230_v31 = vpop.f32.mrf.mxu1  ;;  %v1193_v40 = vpop.f32.mrf.mxu0 }
 0x194   : > { %v4232_v42 = vpop.f32.mrf.mxu1  ;;  %v2876_v58 = vpop.f32.mrf.mxu0 }
 0x196   : > { %v4234_v56 = vpop.f32.mrf.mxu1  ;;  %v1203_v44 = vpop.f32.mrf.mxu0 }
 0x198   : > { %v4236_v59 = vpop.f32.mrf.mxu1  ;;  %v4238_v54 = vpop.f32.mrf.mxu0 }
 0x199   : > { %4393 = vst [vmem:[#allocation9_spill] sm:$0xff] %v4236_v59 }
 0x19a   : > { %v4240_v45 = vpop.f32.mrf.mxu1  ;;  %v4242_v63 = vpop.f32.mrf.mxu0 }
 0x19b   : > { %4394 = vst [vmem:[#allocation10_spill] sm:$0xff] %v4240_v45  ;;  %v832_v45 = vadd.f32 %v4164_v10, %v638_v12  ;;  %v857_v12 = vadd.f32 %v4170_v14, %v4180_v18 }
 0x19c   : > { %v4244_v60 = vpop.f32.mrf.mxu1  ;;  %v4246_v61 = vpop.f32.mrf.mxu0 }
 0x19d   : > { %4395 = vst [vmem:[#allocation11_spill] sm:$0xff] %v4244_v60  ;;  %v1252_v59 = vadd.f32 %v1173_v19, %v832_v45  ;;  %v1257_v45 = vadd.f32 %v2873_v52, %v857_v12 }
 0x19e   : > { %v4248_v62 = vpop.f32.mrf.mxu1  ;;  %v4250_v9 = vpop.f32.mrf.mxu0 }
 0x19f   : > { %4396 = vst [vmem:[#allocation12_spill] sm:$0xff] %v4248_v62  ;;  %v847_v62 = vadd.f32 %v4166_v5, %v2806_v15  ;;  %v852_v5 = vadd.f32 %v4172_v37, %v4184_v23  ;;  %v862_v23 = vadd.f32 %v4178_v41, %v4192_v20  ;;  %v1615_v52 = vadd.f32 %v4222_v47, %v1257_v45  ;;  %v4401_v45 = vld [vmem:[#allocation7_spill] sm:$0xff] }
 0x1a0   : > { %v4252_v0 = vpop.f32.mrf.mxu1  ;;  %v4254_v53 = vpop.f32.mrf.mxu0  ;;  %v872_v20 = vadd.f32 %v4186_v6, %v4200_v34 }
 0x1a1   : > { %4397 = vst [vmem:[#allocation13_spill] sm:$0xff] %v4252_v0  ;;  %v842_v0 = vadd.f32 %v4168_v8, %v4176_v17  ;;  %v1255_v2 = vadd.f32 %v2870_v49, %v847_v62  ;;  %v1256_v62 = vadd.f32 %v1193_v40, %v852_v5 }
 0x1a2   : > { %v2963_v13 = vpop.f32.mrf.mxu1  ;;  %v4256_v24 = vpop.f32.mrf.mxu0 }
 0x1a3   : > { %4398 = vst [vmem:[#allocation14_spill] sm:$0xff] %v4256_v24  ;;  %v1254_v30 = vadd.f32 %v1183_v57, %v842_v0  ;;  %v1613_v17 = vadd.f32 %v2902_v43, %v1255_v2  ;;  %v1259_v57 = vadd.f32 %v2876_v58, %v867_v35  ;;  %v1614_v41 = vadd.f32 %v4224_v48, %v1256_v62 }
 0x1a4   : > { %v2247_v46 = vpop.f32.mrf.mxu1  ;;  %v4259_v60 = vpop.f32.mrf.mxu0  ;;  %v1260_v48 = vadd.f32 %v4242_v63, %v872_v20  ;;  %v897_v63 = vadd.f32 %v4198_v33, %v4212_v27 }
 0x1a5   : > { %4399 = vst [vmem:[#allocation15_spill] sm:$0xff] %v4259_v60  ;;  %v1610_v60 = vadd.f32 %v1531_v7, %v1252_v59  ;;  %v1612_v18 = vadd.f32 %v4220_v38, %v1254_v30  ;;  %v1258_v59 = vadd.f32 %v1203_v44, %v862_v23  ;;  %v887_v44 = vadd.f32 %v4190_v26, %v4204_v3 }
 0x1a6   : > { %v2966_v21 = vpop.f32.mrf.mxu1  ;;  %v4263_v39 = vpop.f32.mrf.mxu0  ;;  %v1618_v5 = vadd.f32 %v4232_v42, %v1260_v48 }
 0x1a7   : > { %4400 = vst [vmem:[#allocation16_spill] sm:$0xff] %v4263_v39  ;;  %v1616_v2 = vadd.f32 %v4228_v51, %v1258_v59 }
 0x1a8   : > { %v2257_v24 = vpop.f32.mrf.mxu1  ;;  %v2931_v10 = vpop.f32.mrf.mxu0 }
 0x1a9   : > { %v1969_v1 = vadd.f32 %v2931_v10, %v1611_v29 }
 0x1aa   : > { %v2969_v15 = vpop.f32.mrf.mxu1  ;;  %v1889_v19 = vpop.f32.mrf.mxu0 }
 0x1ab   : > { %v2327_v39 = vadd.f32 %v2963_v13, %v1969_v1  ;;  %v1968_v8 = vadd.f32 %v1889_v19, %v1610_v60  ;;  %v1265_v19 = vadd.f32 %v4254_v53, %v897_v63  ;;  %v4405_v53 = vld [vmem:[#allocation8_spill] sm:$0xff] }
 0x1ac   : > { %v2267_v36 = vpop.f32.mrf.mxu1  ;;  %v2934_v49 = vpop.f32.mrf.mxu0  ;;  %v4407_v23 = vld [vmem:[#allocation15_spill] sm:$0xff] }
 0x1ad   : > { %2343 = vst [vmem:[%s4275_s30 + $0x8] sm:$0xff] %v2327_v39  ;;  %v2326_v14 = vadd.f32 %v2247_v46, %v1968_v8  ;;  %v1971_v37 = vadd.f32 %v2934_v49, %v1613_v17  ;;  %v877_v39 = vadd.f32 %v4182_v22, %v4196_v32  ;;  %v1617_v32 = vadd.f32 %v4226_v50, %v1259_v57  ;;  %v4408_v57 = vld [vmem:[#allocation10_spill] sm:$0xff] }
 0x1ae   : > { %v2972_v7 = vpop.f32.mrf.mxu1  ;;  %v1899_v43 = vpop.f32.mrf.mxu0  ;;  %v1263_v50 = vadd.f32 %v4246_v61, %v887_v44  ;;  %v892_v61 = vadd.f32 %v4202_v11, %v4214_v55  ;;  %v4404_v55 = vld [vmem:[#allocation9_spill] sm:$0xff] }
 0x1af   : > { %2342 = vst [vmem:[%s4275_s30] sm:$0xff] %v2326_v14  ;;  %v2329_v16 = vadd.f32 %v2966_v21, %v1971_v37  ;;  %v1970_v25 = vadd.f32 %v1899_v43, %v1612_v18  ;;  %v1261_v0 = vadd.f32 %v4238_v54, %v877_v39  ;;  %v882_v54 = vadd.f32 %v4194_v28, %v4208_v4  ;;  %v4406_v14 = vld [vmem:[#allocation6_spill] sm:$0xff]  ;;  %v4409_v39 = vld [vmem:[#allocation16_spill] sm:$0xff] }
 0x1b0   : > { %v2277_v40 = vpop.f32.mrf.mxu1  ;;  %v2937_v46 = vpop.f32.mrf.mxu0  ;;  %v1621_v27 = vadd.f32 %v4234_v56, %v1263_v50  ;;  %v902_v37 = vadd.f32 %v4406_v14, %v4405_v53 }
 0x1b1   : > { %2345 = vst [vmem:[%s4275_s30 + $0x18] sm:$0xff] %v2329_v16  ;;  %v2328_v38 = vadd.f32 %v2257_v24, %v1970_v25  ;;  %v1973_v60 = vadd.f32 %v2937_v46, %v1615_v52  ;;  %v1619_v12 = vadd.f32 %v4230_v31, %v1261_v0  ;;  %v1262_v51 = vadd.f32 %v4250_v9, %v882_v54  ;;  %v4402_v9 = vld [vmem:[#allocation5_spill] sm:$0xff] }
 0x1b2   : > { %v2975_v58 = vpop.f32.mrf.mxu1  ;;  %v1909_v21 = vpop.f32.mrf.mxu0  ;;  %v907_v8 = vadd.f32 %v4402_v9, %v4401_v45  ;;  %v1623_v16 = vadd.f32 %v4408_v57, %v1265_v19 }
 0x1b3   : > { %2344 = vst [vmem:[%s4275_s30 + $0x10] sm:$0xff] %v2328_v38  ;;  %v2331_v47 = vadd.f32 %v2969_v15, %v1973_v60  ;;  %v1972_v22 = vadd.f32 %v1909_v21, %v1614_v41  ;;  %v1620_v62 = vadd.f32 %v4404_v55, %v1262_v51  ;;  %v4410_v38 = vld [vmem:[#allocation11_spill] sm:$0xff]  ;;  %v4411_v21 = vld [vmem:[#allocation12_spill] sm:$0xff] }
 0x1b4   : > { %v2287_v13 = vpop.f32.mrf.mxu1  ;;  %v2940_v24 = vpop.f32.mrf.mxu0  ;;  %v1267_v56 = vadd.f32 %v4407_v23, %v907_v8 }
 0x1b5   : > { %2347 = vst [vmem:[%s4275_s30 + $0x28] sm:$0xff] %v2331_v47  ;;  %v2330_v6 = vadd.f32 %v2267_v36, %v1972_v22  ;;  %v1975_v34 = vadd.f32 %v2940_v24, %v1617_v32  ;;  %v4403_v36 = vld [vmem:[#allocation14_spill] sm:$0xff] }
 0x1b6   : > { %v2978_v29 = vpop.f32.mrf.mxu1  ;;  %v1919_v10 = vpop.f32.mrf.mxu0  ;;  %v1264_v42 = vadd.f32 %v4403_v36, %v892_v61  ;;  %v1625_v0 = vadd.f32 %v4411_v21, %v1267_v56 }
 0x1b7   : > { %2346 = vst [vmem:[%s4275_s30 + $0x20] sm:$0xff] %v2330_v6  ;;  %v2333_v26 = vadd.f32 %v2972_v7, %v1975_v34  ;;  %v1974_v3 = vadd.f32 %v1919_v10, %v1616_v2 }
 0x1b8   : > { %v2297_v30 = vpop.f32.mrf.mxu1  ;;  %v2943_v1 = vpop.f32.mrf.mxu0  ;;  %v1622_v60 = vadd.f32 %v4410_v38, %v1264_v42 }
 0x1b9   : > { %2349 = vst [vmem:[%s4275_s30 + $0x38] sm:$0xff] %v2333_v26  ;;  %v2332_v28 = vadd.f32 %v2277_v40, %v1974_v3  ;;  %v1977_v4 = vadd.f32 %v2943_v1, %v1619_v12  ;;  %v1266_v40 = vadd.f32 %v4409_v39, %v902_v37 }
 0x1ba   : > { %v1929_v15 = vpop.f32.mrf.mxu0  ;;  %v2981_v17 = vpop.f32.mrf.mxu1 }
 0x1bb   : > { %2348 = vst [vmem:[%s4275_s30 + $0x30] sm:$0xff] %v2332_v28  ;;  %v2335_v31 = vadd.f32 %v2975_v58, %v1977_v4  ;;  %v1976_v33 = vadd.f32 %v1929_v15, %v1618_v5 }
 0x1bc   : > { %v2946_v35 = vpop.f32.mrf.mxu0  ;;  %v2307_v25 = vpop.f32.mrf.mxu1 }
 0x1bd   : > { %2351 = vst [vmem:[%s4275_s30 + $0x48] sm:$0xff] %v2335_v31  ;;  %v2334_v49 = vadd.f32 %v2287_v13, %v1976_v33  ;;  %v1979_v11 = vadd.f32 %v2946_v35, %v1621_v27  ;;  %v4412_v13 = vld [vmem:[#allocation13_spill] sm:$0xff] }
 0x1be   : > { %v1939_v18 = vpop.f32.mrf.mxu0  ;;  %v2984_v47 = vpop.f32.mrf.mxu1  ;;  %v1624_v24 = vadd.f32 %v4412_v13, %v1266_v40 }
 0x1bf   : > { %2350 = vst [vmem:[%s4275_s30 + $0x40] sm:$0xff] %v2334_v49  ;;  %v2337_v7 = vadd.f32 %v2978_v29, %v1979_v11  ;;  %v1978_v43 = vadd.f32 %v1939_v18, %v1620_v62 }
 0x1c0   : > { %v2949_v52 = vpop.f32.mrf.mxu0  ;;  %v2317_v2 = vpop.f32.mrf.mxu1 }
 0x1c1   : > { %2353 = vst [vmem:[%s4275_s30 + $0x58] sm:$0xff] %v2337_v7  ;;  %v2336_v46 = vadd.f32 %v2297_v30, %v1978_v43  ;;  %v1981_v59 = vadd.f32 %v2949_v52, %v1623_v16 }
 0x1c2   : > { %v1949_v41 = vpop.f32.mrf.mxu0 }
 0x1c3   : > { %2352 = vst [vmem:[%s4275_s30 + $0x50] sm:$0xff] %v2336_v46  ;;  %v2339_v20 = vadd.f32 %v2981_v17, %v1981_v59  ;;  %v1980_v58 = vadd.f32 %v1949_v41, %v1622_v60 }
 0x1c4   : > { %v2952_v22 = vpop.f32.mrf.mxu0 }
 0x1c5   : > { %2355 = vst [vmem:[%s4275_s30 + $0x68] sm:$0xff] %v2339_v20  ;;  %v2338_v32 = vadd.f32 %v2307_v25, %v1980_v58  ;;  %v1983_v44 = vadd.f32 %v2952_v22, %v1625_v0 }
 0x1c6   : > { %v1959_v48 = vpop.f32.mrf.mxu0 }
 0x1c7   : > { %2354 = vst [vmem:[%s4275_s30 + $0x60] sm:$0xff] %v2338_v32  ;;  %v2341_v6 = vadd.f32 %v2984_v47, %v1983_v44  ;;  %v1982_v34 = vadd.f32 %v1959_v48, %v1624_v24 }
 0x1c9   : > { %2357 = vst [vmem:[%s4275_s30 + $0x78] sm:$0xff] %v2341_v6  ;;  %v2340_v54 = vadd.f32 %v2317_v2, %v1982_v34 }
 0x1cb   : > { %2356 = vst [vmem:[%s4275_s30 + $0x70] sm:$0xff] %v2340_v54 }
 0x1cc   : > { %3283 = shalt.err (!%p3280_p3)
}
 0x1cd   : > { %s3284_s11 = scalar_lea.hbm %s4335_s8, 2048  ;;  %s3288_s20 = scalar_lea.hbm %s4386_s3, 4096 }
 0x1ce   : > { %p3285_p4 = scmp.ne.s32.totalorder %s4335_s8, %s3284_s11  ;;  %p3289_p9 = scmp.lt.s32.totalorder %s4335_s8, %s4386_s3 }
 0x1cf   : > { %p3290_p10 = scmp.lt.s32.totalorder %s3288_s20, %s3284_s11 }
 0x1d0   : > { %p3286_p7 = pnand %p3285_p4, %p3395_p5 }
 0x1d1   : > { %p3291_p11 = por %p3290_p10, %p3289_p9 }
 0x1d2   : > { %p3287_p8 = pneg %p3286_p7 }
 0x1d4   : > { %p3292_p12 = pnand %p3291_p11, %p3287_p8 }
 0x1d6   : > { %3295 = shalt.err (!%p3292_p12)
}
 0x1d7   : > { %s3335_s27 = smov 128   ;;  %s3336_s28 = smov 8  }
 0x1d8   : > { %2985 = dma.vmem_to_hbm [thread:$0]  (%p3395_p5), %s4337_s6, 2048, %s4335_s8, %s4343_s16, %s3335_s27, %s3335_s27, %s3336_s28  }
 0x1d9 PF: > { %p2991_p13 = scmp.ge.s32.totalorder %s3330_s15, 2  ;;  %s2387_s30 = sand.u32 1, %s3318_s12  }
 0x1da   : > { %s2388_s4 = scalar_lea.sflag [#allocation3], %s2387_s30 }
 0x1db   : > { %p2988_p0 = pnand %p2991_p13, %p3399_p6 }
 0x1dd   : > { %p2989_p1 = pneg %p2988_p0 }
 0x1df   : > { %3313 = dma.done.wait (%p2989_p1), %s2388_s4, 2048  }
 0x1e0   : > { %3315 = vsyncadd (%p2989_p1), %s2388_s4, 4294965248  ;;  %p13_p2 = scmp.ge.s32.totalorder %s3382_s18, 4   ;;  %s4413_s12 = smov %s3322_s13 }
 0x1e1   : > { %s4414_s13 = smov %s3326_s14  ;;  %s4415_s14 = smov %s3393_s21 }
 0x1e2   : > { %s4416_s15 = smov %s3382_s18  ;;  %15 = sbr.rel (!%p13_p2) target bundleno = 3 (0x3), region = 75 }
 0x1e7   :  { %2393 = vsyncpa [#allocation3], 1 }
 0x1e8   :  { %2395 = vsyncpa [#allocation3 + $0x1], 1 }

</bundles_post_ra>
